<compile_context>
chip_gen: v7x
topology: tpu7x:2x2x1
jax: 0.10.0
libtpu: 0.0.40
codegen_flags: <defaults>
</compile_context>

<pallas_src>
import jax
import jax.numpy as jnp
from jax.experimental import pallas as pl
from jax.experimental.pallas import tpu as pltpu


def _interest_extractor_kernel(len_ref, keys_ref,
                               wir_ref, wiz_ref, win_ref,
                               whr_ref, whz_ref, whn_ref,
                               br_ref, bz_ref, bin_ref, bhn_ref,
                               out_ref):
    S, TB, H = keys_ref.shape

    # Recurrent (hidden-side) weights, gate-separated -> lane-aligned [TB, H] results.
    whr = whr_ref[...]
    whz = whz_ref[...]
    whn = whn_ref[...]
    bhn = bhn_ref[...]

    # Validity mask for all (t, b) in one vectorized compare: mask[t, b, 0] = t < len[b].
    t_iota = jax.lax.broadcasted_iota(jnp.int32, (S, TB, 1), 0)
    mask = (t_iota < len_ref[...][None, :, :]).astype(jnp.float32)        # [S, TB, 1]

    # Hoist the input-side GRU matmuls out of the serial recurrence:
    # one large [S*TB, H] x [H, H] matmul per gate instead of S tiny matmuls
    # on the critical path.  b_ir+b_hr / b_iz+b_hz are already folded in.
    k2 = keys_ref[...].reshape(S * TB, H)
    gi_r = (jnp.dot(k2, wir_ref[...], preferred_element_type=jnp.float32)
            + br_ref[...]).reshape(S, TB, H)
    gi_z = (jnp.dot(k2, wiz_ref[...], preferred_element_type=jnp.float32)
            + bz_ref[...]).reshape(S, TB, H)
    gi_n = (jnp.dot(k2, win_ref[...], preferred_element_type=jnp.float32)
            + bin_ref[...]).reshape(S, TB, H)

    h = jnp.zeros((TB, H), jnp.float32)

    # Intrinsically serial recurrence: only h @ W_h* per step remains here.
    # S is small and static -> fully unrolled (the three matmuls per step are
    # independent and pipeline back-to-back through the MXU).
    for t in range(S):
        gh_r = jnp.dot(h, whr, preferred_element_type=jnp.float32)
        gh_z = jnp.dot(h, whz, preferred_element_type=jnp.float32)
        gh_n = jnp.dot(h, whn, preferred_element_type=jnp.float32) + bhn

        r = jax.nn.sigmoid(gi_r[t] + gh_r)
        z = jax.nn.sigmoid(gi_z[t] + gh_z)
        n = jnp.tanh(gi_n[t] + r * gh_n)
        h_new = n + z * (h - n)                              # == (1-z)*n + z*h

        m = mask[t]                                          # [TB, 1]
        h = h + m * (h_new - h)                              # freeze state past length
        out_ref[t] = (m * h_new).astype(out_ref.dtype)       # padded interests == 0


def interest_extractor_forward(keys, keys_length, params, *, block_b=None):
    """keys [B, S, H] f32, keys_length [B, 1] int -> interests [B, S, H] f32."""
    B, S, H = keys.shape
    if block_b is None:
        block_b = min(B, 128)                 # batch tile (sublane-aligned for big B)

    # Pad batch to a multiple of the tile; padded rows get length 0 -> zero rows.
    Bp = ((B + block_b - 1) // block_b) * block_b
    pad = Bp - B
    keys_f = keys.astype(jnp.float32)
    lens = keys_length.astype(jnp.int32).reshape(B, 1)
    if pad:
        keys_f = jnp.pad(keys_f, ((0, pad), (0, 0), (0, 0)))
        lens = jnp.pad(lens, ((0, pad), (0, 0)))

    # Time-major layout so the per-step slice inside the kernel is contiguous.
    keys_tm = jnp.transpose(keys_f, (1, 0, 2))               # [S, Bp, H]

    # Fold the r/z hidden biases into the input-side bias (removes per-step adds).
    b_r = (params["b_ir"] + params["b_hr"]).astype(jnp.float32)
    b_z = (params["b_iz"] + params["b_hz"]).astype(jnp.float32)

    grid = (Bp // block_b,)
    wspec = pl.BlockSpec((H, H), lambda i: (0, 0))
    bspec = pl.BlockSpec((1, H), lambda i: (0, 0))

    out_tm = pl.pallas_call(
        _interest_extractor_kernel,
        out_shape=jax.ShapeDtypeStruct((S, Bp, H), jnp.float32),
        grid=grid,
        in_specs=[
            pl.BlockSpec((block_b, 1), lambda i: (i, 0)),            # keys_length
            pl.BlockSpec((S, block_b, H), lambda i: (0, i, 0)),      # keys (time-major)
            wspec, wspec, wspec,                                     # W_ir, W_iz, W_in
            wspec, wspec, wspec,                                     # W_hr, W_hz, W_hn
            bspec, bspec, bspec, bspec,                              # b_r, b_z, b_in, b_hn
        ],
        out_specs=pl.BlockSpec((S, block_b, H), lambda i: (0, i, 0)),
        compiler_params=pltpu.CompilerParams(
            dimension_semantics=("parallel",)),                      # megacore on v7x
    )(lens, keys_tm,
      params["w_ir"], params["w_iz"], params["w_in"],
      params["w_hr"], params["w_hz"], params["w_hn"],
      b_r, b_z, params["b_in"], params["b_hn"])

    return jnp.transpose(out_tm, (1, 0, 2))[:B]                      # [B, S, H]


def interest_extractor_reference(keys, keys_length, params):
    """Pure-JAX reference with identical semantics (verification only)."""
    B, S, H = keys.shape
    lens = keys_length.astype(jnp.int32).reshape(B, 1)
    h = jnp.zeros((B, H), jnp.float32)
    outs = []
    for t in range(S):
        x = keys[:, t, :].astype(jnp.float32)
        r = jax.nn.sigmoid(x @ params["w_ir"] + params["b_ir"]
                           + h @ params["w_hr"] + params["b_hr"])
        z = jax.nn.sigmoid(x @ params["w_iz"] + params["b_iz"]
                           + h @ params["w_hz"] + params["b_hz"])
        n = jnp.tanh(x @ params["w_in"] + params["b_in"]
                     + r * (h @ params["w_hn"] + params["b_hn"]))
        h_new = (1.0 - z) * n + z * h
        m = (t < lens).astype(jnp.float32)
        h = m * h_new + (1.0 - m) * h
        outs.append(m * h_new)
    return jnp.stack(outs, axis=1)                                   # [B, S, H]


def init_params(key, hidden_size, init_std=0.001):
    """nn.GRU(H, H) params, split per gate (r|z|n) and stored transposed."""
    H = hidden_size
    ks = jax.random.split(key, 12)

    def w(k):
        return jax.random.normal(k, (H, H), jnp.float32) * init_std

    def b(k):
        return jax.random.normal(k, (1, H), jnp.float32) * init_std

    return {
        "w_ir": w(ks[0]), "w_iz": w(ks[1]), "w_in": w(ks[2]),
        "w_hr": w(ks[3]), "w_hz": w(ks[4]), "w_hn": w(ks[5]),
        "b_ir": b(ks[6]), "b_iz": b(ks[7]), "b_in": b(ks[8]),
        "b_hr": b(ks[9]), "b_hz": b(ks[10]), "b_hn": b(ks[11]),
    }


if __name__ == "__main__":
    B, S, H = 8, 8, 32
    key = jax.random.PRNGKey(0)
    k_keys, k_params = jax.random.split(key, 2)

    keys = jax.random.normal(k_keys, (B, S, H), jnp.float32)
    keys_length = jnp.array([[5], [8], [3], [0], [1], [7], [8], [2]], dtype=jnp.int32)
    params = init_params(k_params, H)

    out = interest_extractor_forward(keys, keys_length, params)
    out = jax.block_until_ready(out)

    ref = interest_extractor_reference(keys, keys_length, params)
    assert out.shape == (B, S, H)
    assert jnp.all(jnp.isfinite(out))
    assert jnp.allclose(out, ref, atol=1e-5, rtol=1e-5), "Pallas kernel mismatch vs reference"
    # zero-length sample -> all-zero row; steps past a sample's length -> zero.
    assert jnp.allclose(out[3], 0.0)
    assert jnp.allclose(out[0, 5:], 0.0)

    print("KERNEL_OK")
</pallas_src>

<mosaic_0001>
module attributes {stable_mosaic.version = 11 : i64} {
  func.func @_interest_extractor_kernel(%arg0: i32, %arg1: memref<8x1xi32, #tpu.memory_space<vmem>>, %arg2: memref<8x8x32xf32, #tpu.memory_space<vmem>>, %arg3: memref<32x32xf32, #tpu.memory_space<vmem>>, %arg4: memref<32x32xf32, #tpu.memory_space<vmem>>, %arg5: memref<32x32xf32, #tpu.memory_space<vmem>>, %arg6: memref<32x32xf32, #tpu.memory_space<vmem>>, %arg7: memref<32x32xf32, #tpu.memory_space<vmem>>, %arg8: memref<32x32xf32, #tpu.memory_space<vmem>>, %arg9: memref<1x32xf32, #tpu.memory_space<vmem>>, %arg10: memref<1x32xf32, #tpu.memory_space<vmem>>, %arg11: memref<1x32xf32, #tpu.memory_space<vmem>>, %arg12: memref<1x32xf32, #tpu.memory_space<vmem>>, %arg13: memref<8x8x32xf32, #tpu.memory_space<vmem>>) attributes {dimension_semantics = [#tpu.dimension_semantics<parallel>], iteration_bounds = array<i64: 1>, scalar_prefetch = 0 : i64, scratch_operands = 0 : i64, tpu.core_type = #tpu.core_type<tc>, window_params = [{transform_indices = @transform_0, window_bounds = array<i64: 8, 1>}, {transform_indices = @transform_1, window_bounds = array<i64: 8, 8, 32>}, {pipeline_mode = #tpu.pipeline_mode<synchronous>, transform_indices = @transform_2, window_bounds = array<i64: 32, 32>}, {pipeline_mode = #tpu.pipeline_mode<synchronous>, transform_indices = @transform_3, window_bounds = array<i64: 32, 32>}, {pipeline_mode = #tpu.pipeline_mode<synchronous>, transform_indices = @transform_4, window_bounds = array<i64: 32, 32>}, {pipeline_mode = #tpu.pipeline_mode<synchronous>, transform_indices = @transform_5, window_bounds = array<i64: 32, 32>}, {pipeline_mode = #tpu.pipeline_mode<synchronous>, transform_indices = @transform_6, window_bounds = array<i64: 32, 32>}, {pipeline_mode = #tpu.pipeline_mode<synchronous>, transform_indices = @transform_7, window_bounds = array<i64: 32, 32>}, {pipeline_mode = #tpu.pipeline_mode<synchronous>, transform_indices = @transform_8, window_bounds = array<i64: 1, 32>}, {pipeline_mode = #tpu.pipeline_mode<synchronous>, transform_indices = @transform_9, window_bounds = array<i64: 1, 32>}, {pipeline_mode = #tpu.pipeline_mode<synchronous>, transform_indices = @transform_10, window_bounds = array<i64: 1, 32>}, {pipeline_mode = #tpu.pipeline_mode<synchronous>, transform_indices = @transform_11, window_bounds = array<i64: 1, 32>}, {transform_indices = @transform_12, window_bounds = array<i64: 8, 8, 32>}]} {
    %c0 = arith.constant 0 : index
    %c0_0 = arith.constant 0 : index
    %0 = vector.load %arg6[%c0, %c0_0] : memref<32x32xf32, #tpu.memory_space<vmem>>, vector<32x32xf32>
    %c0_1 = arith.constant 0 : index
    %c0_2 = arith.constant 0 : index
    %1 = vector.load %arg7[%c0_1, %c0_2] : memref<32x32xf32, #tpu.memory_space<vmem>>, vector<32x32xf32>
    %c0_3 = arith.constant 0 : index
    %c0_4 = arith.constant 0 : index
    %2 = vector.load %arg8[%c0_3, %c0_4] : memref<32x32xf32, #tpu.memory_space<vmem>>, vector<32x32xf32>
    %c0_5 = arith.constant 0 : index
    %c0_6 = arith.constant 0 : index
    %3 = vector.load %arg12[%c0_5, %c0_6] : memref<1x32xf32, #tpu.memory_space<vmem>>, vector<1x32xf32>
    %4 = tpu.iota {dimensions = array<i32: 0>} : vector<8x8x1xi32>
    %c0_7 = arith.constant 0 : index
    %c0_8 = arith.constant 0 : index
    %5 = vector.load %arg1[%c0_7, %c0_8] : memref<8x1xi32, #tpu.memory_space<vmem>>, vector<8x1xi32>
    %6 = vector.shape_cast %5 : vector<8x1xi32> to vector<1x8x1xi32>
    %7 = vector.broadcast %6 : vector<1x8x1xi32> to vector<8x8x1xi32>
    %8 = arith.cmpi slt, %4, %7 : vector<8x8x1xi32>
    %9 = arith.extui %8 : vector<8x8x1xi1> to vector<8x8x1xi32>
    %10 = arith.sitofp %9 : vector<8x8x1xi32> to vector<8x8x1xf32>
    %c0_9 = arith.constant 0 : index
    %c0_10 = arith.constant 0 : index
    %c0_11 = arith.constant 0 : index
    %11 = vector.load %arg2[%c0_9, %c0_10, %c0_11] : memref<8x8x32xf32, #tpu.memory_space<vmem>>, vector<8x8x32xf32>
    %12 = vector.shape_cast %11 : vector<8x8x32xf32> to vector<64x32xf32>
    %c0_12 = arith.constant 0 : index
    %c0_13 = arith.constant 0 : index
    %13 = vector.load %arg3[%c0_12, %c0_13] : memref<32x32xf32, #tpu.memory_space<vmem>>, vector<32x32xf32>
    %cst = arith.constant dense<0.000000e+00> : vector<64x32xf32>
    %14 = tpu.matmul %12, %13, %cst {dimension_numbers = #tpu.dot_dimension_numbers<[1], [0], [0], [1], [0, 0, 1, 1], [], []>} : vector<64x32xf32>, vector<32x32xf32>, vector<64x32xf32> -> vector<64x32xf32>
    %c0_14 = arith.constant 0 : index
    %c0_15 = arith.constant 0 : index
    %15 = vector.load %arg9[%c0_14, %c0_15] : memref<1x32xf32, #tpu.memory_space<vmem>>, vector<1x32xf32>
    %16 = vector.broadcast %15 : vector<1x32xf32> to vector<64x32xf32>
    %17 = arith.addf %14, %16 : vector<64x32xf32>
    %18 = vector.shape_cast %17 : vector<64x32xf32> to vector<8x8x32xf32>
    %c0_16 = arith.constant 0 : index
    %c0_17 = arith.constant 0 : index
    %19 = vector.load %arg4[%c0_16, %c0_17] : memref<32x32xf32, #tpu.memory_space<vmem>>, vector<32x32xf32>
    %cst_18 = arith.constant dense<0.000000e+00> : vector<64x32xf32>
    %20 = tpu.matmul %12, %19, %cst_18 {dimension_numbers = #tpu.dot_dimension_numbers<[1], [0], [0], [1], [0, 0, 1, 1], [], []>} : vector<64x32xf32>, vector<32x32xf32>, vector<64x32xf32> -> vector<64x32xf32>
    %c0_19 = arith.constant 0 : index
    %c0_20 = arith.constant 0 : index
    %21 = vector.load %arg10[%c0_19, %c0_20] : memref<1x32xf32, #tpu.memory_space<vmem>>, vector<1x32xf32>
    %22 = vector.broadcast %21 : vector<1x32xf32> to vector<64x32xf32>
    %23 = arith.addf %20, %22 : vector<64x32xf32>
    %24 = vector.shape_cast %23 : vector<64x32xf32> to vector<8x8x32xf32>
    %c0_21 = arith.constant 0 : index
    %c0_22 = arith.constant 0 : index
    %25 = vector.load %arg5[%c0_21, %c0_22] : memref<32x32xf32, #tpu.memory_space<vmem>>, vector<32x32xf32>
    %cst_23 = arith.constant dense<0.000000e+00> : vector<64x32xf32>
    %26 = tpu.matmul %12, %25, %cst_23 {dimension_numbers = #tpu.dot_dimension_numbers<[1], [0], [0], [1], [0, 0, 1, 1], [], []>} : vector<64x32xf32>, vector<32x32xf32>, vector<64x32xf32> -> vector<64x32xf32>
    %c0_24 = arith.constant 0 : index
    %c0_25 = arith.constant 0 : index
    %27 = vector.load %arg11[%c0_24, %c0_25] : memref<1x32xf32, #tpu.memory_space<vmem>>, vector<1x32xf32>
    %28 = vector.broadcast %27 : vector<1x32xf32> to vector<64x32xf32>
    %29 = arith.addf %26, %28 : vector<64x32xf32>
    %30 = vector.shape_cast %29 : vector<64x32xf32> to vector<8x8x32xf32>
    %cst_26 = arith.constant 0.000000e+00 : f32
    %31 = vector.broadcast %cst_26 : f32 to vector<8x32xf32>
    %cst_27 = arith.constant dense<0.000000e+00> : vector<8x32xf32>
    %32 = tpu.matmul %31, %0, %cst_27 {dimension_numbers = #tpu.dot_dimension_numbers<[1], [0], [0], [1], [0, 0, 1, 1], [], []>} : vector<8x32xf32>, vector<32x32xf32>, vector<8x32xf32> -> vector<8x32xf32>
    %cst_28 = arith.constant dense<0.000000e+00> : vector<8x32xf32>
    %33 = tpu.matmul %31, %1, %cst_28 {dimension_numbers = #tpu.dot_dimension_numbers<[1], [0], [0], [1], [0, 0, 1, 1], [], []>} : vector<8x32xf32>, vector<32x32xf32>, vector<8x32xf32> -> vector<8x32xf32>
    %cst_29 = arith.constant dense<0.000000e+00> : vector<8x32xf32>
    %34 = tpu.matmul %31, %2, %cst_29 {dimension_numbers = #tpu.dot_dimension_numbers<[1], [0], [0], [1], [0, 0, 1, 1], [], []>} : vector<8x32xf32>, vector<32x32xf32>, vector<8x32xf32> -> vector<8x32xf32>
    %35 = vector.broadcast %3 : vector<1x32xf32> to vector<8x32xf32>
    %36 = arith.addf %34, %35 : vector<8x32xf32>
    %37 = vector.extract_strided_slice %18 {offsets = [0, 0, 0], sizes = [1, 8, 32], strides = [1, 1, 1]} : vector<8x8x32xf32> to vector<1x8x32xf32>
    %38 = vector.shape_cast %37 : vector<1x8x32xf32> to vector<8x32xf32>
    %39 = arith.addf %38, %32 : vector<8x32xf32>
    %40 = arith.negf %39 : vector<8x32xf32>
    %41 = math.exp %40 : vector<8x32xf32>
    %cst_30 = arith.constant 1.000000e+00 : f32
    %42 = vector.broadcast %cst_30 : f32 to vector<8x32xf32>
    %43 = arith.addf %42, %41 : vector<8x32xf32>
    %44 = arith.divf %42, %43 : vector<8x32xf32>
    %45 = vector.extract_strided_slice %24 {offsets = [0, 0, 0], sizes = [1, 8, 32], strides = [1, 1, 1]} : vector<8x8x32xf32> to vector<1x8x32xf32>
    %46 = vector.shape_cast %45 : vector<1x8x32xf32> to vector<8x32xf32>
    %47 = arith.addf %46, %33 : vector<8x32xf32>
    %48 = arith.negf %47 : vector<8x32xf32>
    %49 = math.exp %48 : vector<8x32xf32>
    %cst_31 = arith.constant 1.000000e+00 : f32
    %50 = vector.broadcast %cst_31 : f32 to vector<8x32xf32>
    %51 = arith.addf %50, %49 : vector<8x32xf32>
    %52 = arith.divf %50, %51 : vector<8x32xf32>
    %53 = vector.extract_strided_slice %30 {offsets = [0, 0, 0], sizes = [1, 8, 32], strides = [1, 1, 1]} : vector<8x8x32xf32> to vector<1x8x32xf32>
    %54 = vector.shape_cast %53 : vector<1x8x32xf32> to vector<8x32xf32>
    %55 = arith.mulf %44, %36 : vector<8x32xf32>
    %56 = arith.addf %54, %55 : vector<8x32xf32>
    %57 = math.tanh %56 : vector<8x32xf32>
    %58 = arith.subf %31, %57 : vector<8x32xf32>
    %59 = arith.mulf %52, %58 : vector<8x32xf32>
    %60 = arith.addf %57, %59 : vector<8x32xf32>
    %61 = vector.extract_strided_slice %10 {offsets = [0, 0, 0], sizes = [1, 8, 1], strides = [1, 1, 1]} : vector<8x8x1xf32> to vector<1x8x1xf32>
    %62 = vector.shape_cast %61 : vector<1x8x1xf32> to vector<8x1xf32>
    %63 = arith.subf %60, %31 : vector<8x32xf32>
    %64 = vector.broadcast %62 : vector<8x1xf32> to vector<8x32xf32>
    %65 = arith.mulf %64, %63 : vector<8x32xf32>
    %66 = arith.addf %31, %65 : vector<8x32xf32>
    %67 = vector.broadcast %62 : vector<8x1xf32> to vector<8x32xf32>
    %68 = arith.mulf %67, %60 : vector<8x32xf32>
    %c0_32 = arith.constant 0 : index
    %c0_33 = arith.constant 0 : index
    %c0_34 = arith.constant 0 : index
    %69 = vector.load %arg13[%c0_32, %c0_33, %c0_34] : memref<8x8x32xf32, #tpu.memory_space<vmem>>, vector<1x8x32xf32>
    %70 = vector.shape_cast %69 : vector<1x8x32xf32> to vector<8x32xf32>
    %71 = vector.shape_cast %68 : vector<8x32xf32> to vector<1x8x32xf32>
    tpu.vector_store %arg13[%c0_32, %c0_33, %c0_34], %71 {strides = array<i32>} : memref<8x8x32xf32, #tpu.memory_space<vmem>>, vector<1x8x32xf32>,
    %cst_35 = arith.constant dense<0.000000e+00> : vector<8x32xf32>
    %72 = tpu.matmul %66, %0, %cst_35 {dimension_numbers = #tpu.dot_dimension_numbers<[1], [0], [0], [1], [0, 0, 1, 1], [], []>} : vector<8x32xf32>, vector<32x32xf32>, vector<8x32xf32> -> vector<8x32xf32>
    %cst_36 = arith.constant dense<0.000000e+00> : vector<8x32xf32>
    %73 = tpu.matmul %66, %1, %cst_36 {dimension_numbers = #tpu.dot_dimension_numbers<[1], [0], [0], [1], [0, 0, 1, 1], [], []>} : vector<8x32xf32>, vector<32x32xf32>, vector<8x32xf32> -> vector<8x32xf32>
    %cst_37 = arith.constant dense<0.000000e+00> : vector<8x32xf32>
    %74 = tpu.matmul %66, %2, %cst_37 {dimension_numbers = #tpu.dot_dimension_numbers<[1], [0], [0], [1], [0, 0, 1, 1], [], []>} : vector<8x32xf32>, vector<32x32xf32>, vector<8x32xf32> -> vector<8x32xf32>
    %75 = vector.broadcast %3 : vector<1x32xf32> to vector<8x32xf32>
    %76 = arith.addf %74, %75 : vector<8x32xf32>
    %77 = vector.extract_strided_slice %18 {offsets = [1, 0, 0], sizes = [1, 8, 32], strides = [1, 1, 1]} : vector<8x8x32xf32> to vector<1x8x32xf32>
    %78 = vector.shape_cast %77 : vector<1x8x32xf32> to vector<8x32xf32>
    %79 = arith.addf %78, %72 : vector<8x32xf32>
    %80 = arith.negf %79 : vector<8x32xf32>
    %81 = math.exp %80 : vector<8x32xf32>
    %cst_38 = arith.constant 1.000000e+00 : f32
    %82 = vector.broadcast %cst_38 : f32 to vector<8x32xf32>
    %83 = arith.addf %82, %81 : vector<8x32xf32>
    %84 = arith.divf %82, %83 : vector<8x32xf32>
    %85 = vector.extract_strided_slice %24 {offsets = [1, 0, 0], sizes = [1, 8, 32], strides = [1, 1, 1]} : vector<8x8x32xf32> to vector<1x8x32xf32>
    %86 = vector.shape_cast %85 : vector<1x8x32xf32> to vector<8x32xf32>
    %87 = arith.addf %86, %73 : vector<8x32xf32>
    %88 = arith.negf %87 : vector<8x32xf32>
    %89 = math.exp %88 : vector<8x32xf32>
    %cst_39 = arith.constant 1.000000e+00 : f32
    %90 = vector.broadcast %cst_39 : f32 to vector<8x32xf32>
    %91 = arith.addf %90, %89 : vector<8x32xf32>
    %92 = arith.divf %90, %91 : vector<8x32xf32>
    %93 = vector.extract_strided_slice %30 {offsets = [1, 0, 0], sizes = [1, 8, 32], strides = [1, 1, 1]} : vector<8x8x32xf32> to vector<1x8x32xf32>
    %94 = vector.shape_cast %93 : vector<1x8x32xf32> to vector<8x32xf32>
    %95 = arith.mulf %84, %76 : vector<8x32xf32>
    %96 = arith.addf %94, %95 : vector<8x32xf32>
    %97 = math.tanh %96 : vector<8x32xf32>
    %98 = arith.subf %66, %97 : vector<8x32xf32>
    %99 = arith.mulf %92, %98 : vector<8x32xf32>
    %100 = arith.addf %97, %99 : vector<8x32xf32>
    %101 = vector.extract_strided_slice %10 {offsets = [1, 0, 0], sizes = [1, 8, 1], strides = [1, 1, 1]} : vector<8x8x1xf32> to vector<1x8x1xf32>
    %102 = vector.shape_cast %101 : vector<1x8x1xf32> to vector<8x1xf32>
    %103 = arith.subf %100, %66 : vector<8x32xf32>
    %104 = vector.broadcast %102 : vector<8x1xf32> to vector<8x32xf32>
    %105 = arith.mulf %104, %103 : vector<8x32xf32>
    %106 = arith.addf %66, %105 : vector<8x32xf32>
    %107 = vector.broadcast %102 : vector<8x1xf32> to vector<8x32xf32>
    %108 = arith.mulf %107, %100 : vector<8x32xf32>
    %c1 = arith.constant 1 : index
    %c0_40 = arith.constant 0 : index
    %c0_41 = arith.constant 0 : index
    %109 = vector.load %arg13[%c1, %c0_40, %c0_41] : memref<8x8x32xf32, #tpu.memory_space<vmem>>, vector<1x8x32xf32>
    %110 = vector.shape_cast %109 : vector<1x8x32xf32> to vector<8x32xf32>
    %111 = vector.shape_cast %108 : vector<8x32xf32> to vector<1x8x32xf32>
    tpu.vector_store %arg13[%c1, %c0_40, %c0_41], %111 {strides = array<i32>} : memref<8x8x32xf32, #tpu.memory_space<vmem>>, vector<1x8x32xf32>,
    %cst_42 = arith.constant dense<0.000000e+00> : vector<8x32xf32>
    %112 = tpu.matmul %106, %0, %cst_42 {dimension_numbers = #tpu.dot_dimension_numbers<[1], [0], [0], [1], [0, 0, 1, 1], [], []>} : vector<8x32xf32>, vector<32x32xf32>, vector<8x32xf32> -> vector<8x32xf32>
    %cst_43 = arith.constant dense<0.000000e+00> : vector<8x32xf32>
    %113 = tpu.matmul %106, %1, %cst_43 {dimension_numbers = #tpu.dot_dimension_numbers<[1], [0], [0], [1], [0, 0, 1, 1], [], []>} : vector<8x32xf32>, vector<32x32xf32>, vector<8x32xf32> -> vector<8x32xf32>
    %cst_44 = arith.constant dense<0.000000e+00> : vector<8x32xf32>
    %114 = tpu.matmul %106, %2, %cst_44 {dimension_numbers = #tpu.dot_dimension_numbers<[1], [0], [0], [1], [0, 0, 1, 1], [], []>} : vector<8x32xf32>, vector<32x32xf32>, vector<8x32xf32> -> vector<8x32xf32>
    %115 = vector.broadcast %3 : vector<1x32xf32> to vector<8x32xf32>
    %116 = arith.addf %114, %115 : vector<8x32xf32>
    %117 = vector.extract_strided_slice %18 {offsets = [2, 0, 0], sizes = [1, 8, 32], strides = [1, 1, 1]} : vector<8x8x32xf32> to vector<1x8x32xf32>
    %118 = vector.shape_cast %117 : vector<1x8x32xf32> to vector<8x32xf32>
    %119 = arith.addf %118, %112 : vector<8x32xf32>
    %120 = arith.negf %119 : vector<8x32xf32>
    %121 = math.exp %120 : vector<8x32xf32>
    %cst_45 = arith.constant 1.000000e+00 : f32
    %122 = vector.broadcast %cst_45 : f32 to vector<8x32xf32>
    %123 = arith.addf %122, %121 : vector<8x32xf32>
    %124 = arith.divf %122, %123 : vector<8x32xf32>
    %125 = vector.extract_strided_slice %24 {offsets = [2, 0, 0], sizes = [1, 8, 32], strides = [1, 1, 1]} : vector<8x8x32xf32> to vector<1x8x32xf32>
    %126 = vector.shape_cast %125 : vector<1x8x32xf32> to vector<8x32xf32>
    %127 = arith.addf %126, %113 : vector<8x32xf32>
    %128 = arith.negf %127 : vector<8x32xf32>
    %129 = math.exp %128 : vector<8x32xf32>
    %cst_46 = arith.constant 1.000000e+00 : f32
    %130 = vector.broadcast %cst_46 : f32 to vector<8x32xf32>
    %131 = arith.addf %130, %129 : vector<8x32xf32>
    %132 = arith.divf %130, %131 : vector<8x32xf32>
    %133 = vector.extract_strided_slice %30 {offsets = [2, 0, 0], sizes = [1, 8, 32], strides = [1, 1, 1]} : vector<8x8x32xf32> to vector<1x8x32xf32>
    %134 = vector.shape_cast %133 : vector<1x8x32xf32> to vector<8x32xf32>
    %135 = arith.mulf %124, %116 : vector<8x32xf32>
    %136 = arith.addf %134, %135 : vector<8x32xf32>
    %137 = math.tanh %136 : vector<8x32xf32>
    %138 = arith.subf %106, %137 : vector<8x32xf32>
    %139 = arith.mulf %132, %138 : vector<8x32xf32>
    %140 = arith.addf %137, %139 : vector<8x32xf32>
    %141 = vector.extract_strided_slice %10 {offsets = [2, 0, 0], sizes = [1, 8, 1], strides = [1, 1, 1]} : vector<8x8x1xf32> to vector<1x8x1xf32>
    %142 = vector.shape_cast %141 : vector<1x8x1xf32> to vector<8x1xf32>
    %143 = arith.subf %140, %106 : vector<8x32xf32>
    %144 = vector.broadcast %142 : vector<8x1xf32> to vector<8x32xf32>
    %145 = arith.mulf %144, %143 : vector<8x32xf32>
    %146 = arith.addf %106, %145 : vector<8x32xf32>
    %147 = vector.broadcast %142 : vector<8x1xf32> to vector<8x32xf32>
    %148 = arith.mulf %147, %140 : vector<8x32xf32>
    %c2 = arith.constant 2 : index
    %c0_47 = arith.constant 0 : index
    %c0_48 = arith.constant 0 : index
    %149 = vector.load %arg13[%c2, %c0_47, %c0_48] : memref<8x8x32xf32, #tpu.memory_space<vmem>>, vector<1x8x32xf32>
    %150 = vector.shape_cast %149 : vector<1x8x32xf32> to vector<8x32xf32>
    %151 = vector.shape_cast %148 : vector<8x32xf32> to vector<1x8x32xf32>
    tpu.vector_store %arg13[%c2, %c0_47, %c0_48], %151 {strides = array<i32>} : memref<8x8x32xf32, #tpu.memory_space<vmem>>, vector<1x8x32xf32>,
    %cst_49 = arith.constant dense<0.000000e+00> : vector<8x32xf32>
    %152 = tpu.matmul %146, %0, %cst_49 {dimension_numbers = #tpu.dot_dimension_numbers<[1], [0], [0], [1], [0, 0, 1, 1], [], []>} : vector<8x32xf32>, vector<32x32xf32>, vector<8x32xf32> -> vector<8x32xf32>
    %cst_50 = arith.constant dense<0.000000e+00> : vector<8x32xf32>
    %153 = tpu.matmul %146, %1, %cst_50 {dimension_numbers = #tpu.dot_dimension_numbers<[1], [0], [0], [1], [0, 0, 1, 1], [], []>} : vector<8x32xf32>, vector<32x32xf32>, vector<8x32xf32> -> vector<8x32xf32>
    %cst_51 = arith.constant dense<0.000000e+00> : vector<8x32xf32>
    %154 = tpu.matmul %146, %2, %cst_51 {dimension_numbers = #tpu.dot_dimension_numbers<[1], [0], [0], [1], [0, 0, 1, 1], [], []>} : vector<8x32xf32>, vector<32x32xf32>, vector<8x32xf32> -> vector<8x32xf32>
    %155 = vector.broadcast %3 : vector<1x32xf32> to vector<8x32xf32>
    %156 = arith.addf %154, %155 : vector<8x32xf32>
    %157 = vector.extract_strided_slice %18 {offsets = [3, 0, 0], sizes = [1, 8, 32], strides = [1, 1, 1]} : vector<8x8x32xf32> to vector<1x8x32xf32>
    %158 = vector.shape_cast %157 : vector<1x8x32xf32> to vector<8x32xf32>
    %159 = arith.addf %158, %152 : vector<8x32xf32>
    %160 = arith.negf %159 : vector<8x32xf32>
    %161 = math.exp %160 : vector<8x32xf32>
    %cst_52 = arith.constant 1.000000e+00 : f32
    %162 = vector.broadcast %cst_52 : f32 to vector<8x32xf32>
    %163 = arith.addf %162, %161 : vector<8x32xf32>
    %164 = arith.divf %162, %163 : vector<8x32xf32>
    %165 = vector.extract_strided_slice %24 {offsets = [3, 0, 0], sizes = [1, 8, 32], strides = [1, 1, 1]} : vector<8x8x32xf32> to vector<1x8x32xf32>
    %166 = vector.shape_cast %165 : vector<1x8x32xf32> to vector<8x32xf32>
    %167 = arith.addf %166, %153 : vector<8x32xf32>
    %168 = arith.negf %167 : vector<8x32xf32>
    %169 = math.exp %168 : vector<8x32xf32>
    %cst_53 = arith.constant 1.000000e+00 : f32
    %170 = vector.broadcast %cst_53 : f32 to vector<8x32xf32>
    %171 = arith.addf %170, %169 : vector<8x32xf32>
    %172 = arith.divf %170, %171 : vector<8x32xf32>
    %173 = vector.extract_strided_slice %30 {offsets = [3, 0, 0], sizes = [1, 8, 32], strides = [1, 1, 1]} : vector<8x8x32xf32> to vector<1x8x32xf32>
    %174 = vector.shape_cast %173 : vector<1x8x32xf32> to vector<8x32xf32>
    %175 = arith.mulf %164, %156 : vector<8x32xf32>
    %176 = arith.addf %174, %175 : vector<8x32xf32>
    %177 = math.tanh %176 : vector<8x32xf32>
    %178 = arith.subf %146, %177 : vector<8x32xf32>
    %179 = arith.mulf %172, %178 : vector<8x32xf32>
    %180 = arith.addf %177, %179 : vector<8x32xf32>
    %181 = vector.extract_strided_slice %10 {offsets = [3, 0, 0], sizes = [1, 8, 1], strides = [1, 1, 1]} : vector<8x8x1xf32> to vector<1x8x1xf32>
    %182 = vector.shape_cast %181 : vector<1x8x1xf32> to vector<8x1xf32>
    %183 = arith.subf %180, %146 : vector<8x32xf32>
    %184 = vector.broadcast %182 : vector<8x1xf32> to vector<8x32xf32>
    %185 = arith.mulf %184, %183 : vector<8x32xf32>
    %186 = arith.addf %146, %185 : vector<8x32xf32>
    %187 = vector.broadcast %182 : vector<8x1xf32> to vector<8x32xf32>
    %188 = arith.mulf %187, %180 : vector<8x32xf32>
    %c3 = arith.constant 3 : index
    %c0_54 = arith.constant 0 : index
    %c0_55 = arith.constant 0 : index
    %189 = vector.load %arg13[%c3, %c0_54, %c0_55] : memref<8x8x32xf32, #tpu.memory_space<vmem>>, vector<1x8x32xf32>
    %190 = vector.shape_cast %189 : vector<1x8x32xf32> to vector<8x32xf32>
    %191 = vector.shape_cast %188 : vector<8x32xf32> to vector<1x8x32xf32>
    tpu.vector_store %arg13[%c3, %c0_54, %c0_55], %191 {strides = array<i32>} : memref<8x8x32xf32, #tpu.memory_space<vmem>>, vector<1x8x32xf32>,
    %cst_56 = arith.constant dense<0.000000e+00> : vector<8x32xf32>
    %192 = tpu.matmul %186, %0, %cst_56 {dimension_numbers = #tpu.dot_dimension_numbers<[1], [0], [0], [1], [0, 0, 1, 1], [], []>} : vector<8x32xf32>, vector<32x32xf32>, vector<8x32xf32> -> vector<8x32xf32>
    %cst_57 = arith.constant dense<0.000000e+00> : vector<8x32xf32>
    %193 = tpu.matmul %186, %1, %cst_57 {dimension_numbers = #tpu.dot_dimension_numbers<[1], [0], [0], [1], [0, 0, 1, 1], [], []>} : vector<8x32xf32>, vector<32x32xf32>, vector<8x32xf32> -> vector<8x32xf32>
    %cst_58 = arith.constant dense<0.000000e+00> : vector<8x32xf32>
    %194 = tpu.matmul %186, %2, %cst_58 {dimension_numbers = #tpu.dot_dimension_numbers<[1], [0], [0], [1], [0, 0, 1, 1], [], []>} : vector<8x32xf32>, vector<32x32xf32>, vector<8x32xf32> -> vector<8x32xf32>
    %195 = vector.broadcast %3 : vector<1x32xf32> to vector<8x32xf32>
    %196 = arith.addf %194, %195 : vector<8x32xf32>
    %197 = vector.extract_strided_slice %18 {offsets = [4, 0, 0], sizes = [1, 8, 32], strides = [1, 1, 1]} : vector<8x8x32xf32> to vector<1x8x32xf32>
    %198 = vector.shape_cast %197 : vector<1x8x32xf32> to vector<8x32xf32>
    %199 = arith.addf %198, %192 : vector<8x32xf32>
    %200 = arith.negf %199 : vector<8x32xf32>
    %201 = math.exp %200 : vector<8x32xf32>
    %cst_59 = arith.constant 1.000000e+00 : f32
    %202 = vector.broadcast %cst_59 : f32 to vector<8x32xf32>
    %203 = arith.addf %202, %201 : vector<8x32xf32>
    %204 = arith.divf %202, %203 : vector<8x32xf32>
    %205 = vector.extract_strided_slice %24 {offsets = [4, 0, 0], sizes = [1, 8, 32], strides = [1, 1, 1]} : vector<8x8x32xf32> to vector<1x8x32xf32>
    %206 = vector.shape_cast %205 : vector<1x8x32xf32> to vector<8x32xf32>
    %207 = arith.addf %206, %193 : vector<8x32xf32>
    %208 = arith.negf %207 : vector<8x32xf32>
    %209 = math.exp %208 : vector<8x32xf32>
    %cst_60 = arith.constant 1.000000e+00 : f32
    %210 = vector.broadcast %cst_60 : f32 to vector<8x32xf32>
    %211 = arith.addf %210, %209 : vector<8x32xf32>
    %212 = arith.divf %210, %211 : vector<8x32xf32>
    %213 = vector.extract_strided_slice %30 {offsets = [4, 0, 0], sizes = [1, 8, 32], strides = [1, 1, 1]} : vector<8x8x32xf32> to vector<1x8x32xf32>
    %214 = vector.shape_cast %213 : vector<1x8x32xf32> to vector<8x32xf32>
    %215 = arith.mulf %204, %196 : vector<8x32xf32>
    %216 = arith.addf %214, %215 : vector<8x32xf32>
    %217 = math.tanh %216 : vector<8x32xf32>
    %218 = arith.subf %186, %217 : vector<8x32xf32>
    %219 = arith.mulf %212, %218 : vector<8x32xf32>
    %220 = arith.addf %217, %219 : vector<8x32xf32>
    %221 = vector.extract_strided_slice %10 {offsets = [4, 0, 0], sizes = [1, 8, 1], strides = [1, 1, 1]} : vector<8x8x1xf32> to vector<1x8x1xf32>
    %222 = vector.shape_cast %221 : vector<1x8x1xf32> to vector<8x1xf32>
    %223 = arith.subf %220, %186 : vector<8x32xf32>
    %224 = vector.broadcast %222 : vector<8x1xf32> to vector<8x32xf32>
    %225 = arith.mulf %224, %223 : vector<8x32xf32>
    %226 = arith.addf %186, %225 : vector<8x32xf32>
    %227 = vector.broadcast %222 : vector<8x1xf32> to vector<8x32xf32>
    %228 = arith.mulf %227, %220 : vector<8x32xf32>
    %c4 = arith.constant 4 : index
    %c0_61 = arith.constant 0 : index
    %c0_62 = arith.constant 0 : index
    %229 = vector.load %arg13[%c4, %c0_61, %c0_62] : memref<8x8x32xf32, #tpu.memory_space<vmem>>, vector<1x8x32xf32>
    %230 = vector.shape_cast %229 : vector<1x8x32xf32> to vector<8x32xf32>
    %231 = vector.shape_cast %228 : vector<8x32xf32> to vector<1x8x32xf32>
    tpu.vector_store %arg13[%c4, %c0_61, %c0_62], %231 {strides = array<i32>} : memref<8x8x32xf32, #tpu.memory_space<vmem>>, vector<1x8x32xf32>,
    %cst_63 = arith.constant dense<0.000000e+00> : vector<8x32xf32>
    %232 = tpu.matmul %226, %0, %cst_63 {dimension_numbers = #tpu.dot_dimension_numbers<[1], [0], [0], [1], [0, 0, 1, 1], [], []>} : vector<8x32xf32>, vector<32x32xf32>, vector<8x32xf32> -> vector<8x32xf32>
    %cst_64 = arith.constant dense<0.000000e+00> : vector<8x32xf32>
    %233 = tpu.matmul %226, %1, %cst_64 {dimension_numbers = #tpu.dot_dimension_numbers<[1], [0], [0], [1], [0, 0, 1, 1], [], []>} : vector<8x32xf32>, vector<32x32xf32>, vector<8x32xf32> -> vector<8x32xf32>
    %cst_65 = arith.constant dense<0.000000e+00> : vector<8x32xf32>
    %234 = tpu.matmul %226, %2, %cst_65 {dimension_numbers = #tpu.dot_dimension_numbers<[1], [0], [0], [1], [0, 0, 1, 1], [], []>} : vector<8x32xf32>, vector<32x32xf32>, vector<8x32xf32> -> vector<8x32xf32>
    %235 = vector.broadcast %3 : vector<1x32xf32> to vector<8x32xf32>
    %236 = arith.addf %234, %235 : vector<8x32xf32>
    %237 = vector.extract_strided_slice %18 {offsets = [5, 0, 0], sizes = [1, 8, 32], strides = [1, 1, 1]} : vector<8x8x32xf32> to vector<1x8x32xf32>
    %238 = vector.shape_cast %237 : vector<1x8x32xf32> to vector<8x32xf32>
    %239 = arith.addf %238, %232 : vector<8x32xf32>
    %240 = arith.negf %239 : vector<8x32xf32>
    %241 = math.exp %240 : vector<8x32xf32>
    %cst_66 = arith.constant 1.000000e+00 : f32
    %242 = vector.broadcast %cst_66 : f32 to vector<8x32xf32>
    %243 = arith.addf %242, %241 : vector<8x32xf32>
    %244 = arith.divf %242, %243 : vector<8x32xf32>
    %245 = vector.extract_strided_slice %24 {offsets = [5, 0, 0], sizes = [1, 8, 32], strides = [1, 1, 1]} : vector<8x8x32xf32> to vector<1x8x32xf32>
    %246 = vector.shape_cast %245 : vector<1x8x32xf32> to vector<8x32xf32>
    %247 = arith.addf %246, %233 : vector<8x32xf32>
    %248 = arith.negf %247 : vector<8x32xf32>
    %249 = math.exp %248 : vector<8x32xf32>
    %cst_67 = arith.constant 1.000000e+00 : f32
    %250 = vector.broadcast %cst_67 : f32 to vector<8x32xf32>
    %251 = arith.addf %250, %249 : vector<8x32xf32>
    %252 = arith.divf %250, %251 : vector<8x32xf32>
    %253 = vector.extract_strided_slice %30 {offsets = [5, 0, 0], sizes = [1, 8, 32], strides = [1, 1, 1]} : vector<8x8x32xf32> to vector<1x8x32xf32>
    %254 = vector.shape_cast %253 : vector<1x8x32xf32> to vector<8x32xf32>
    %255 = arith.mulf %244, %236 : vector<8x32xf32>
    %256 = arith.addf %254, %255 : vector<8x32xf32>
    %257 = math.tanh %256 : vector<8x32xf32>
    %258 = arith.subf %226, %257 : vector<8x32xf32>
    %259 = arith.mulf %252, %258 : vector<8x32xf32>
    %260 = arith.addf %257, %259 : vector<8x32xf32>
    %261 = vector.extract_strided_slice %10 {offsets = [5, 0, 0], sizes = [1, 8, 1], strides = [1, 1, 1]} : vector<8x8x1xf32> to vector<1x8x1xf32>
    %262 = vector.shape_cast %261 : vector<1x8x1xf32> to vector<8x1xf32>
    %263 = arith.subf %260, %226 : vector<8x32xf32>
    %264 = vector.broadcast %262 : vector<8x1xf32> to vector<8x32xf32>
    %265 = arith.mulf %264, %263 : vector<8x32xf32>
    %266 = arith.addf %226, %265 : vector<8x32xf32>
    %267 = vector.broadcast %262 : vector<8x1xf32> to vector<8x32xf32>
    %268 = arith.mulf %267, %260 : vector<8x32xf32>
    %c5 = arith.constant 5 : index
    %c0_68 = arith.constant 0 : index
    %c0_69 = arith.constant 0 : index
    %269 = vector.load %arg13[%c5, %c0_68, %c0_69] : memref<8x8x32xf32, #tpu.memory_space<vmem>>, vector<1x8x32xf32>
    %270 = vector.shape_cast %269 : vector<1x8x32xf32> to vector<8x32xf32>
    %271 = vector.shape_cast %268 : vector<8x32xf32> to vector<1x8x32xf32>
    tpu.vector_store %arg13[%c5, %c0_68, %c0_69], %271 {strides = array<i32>} : memref<8x8x32xf32, #tpu.memory_space<vmem>>, vector<1x8x32xf32>,
    %cst_70 = arith.constant dense<0.000000e+00> : vector<8x32xf32>
    %272 = tpu.matmul %266, %0, %cst_70 {dimension_numbers = #tpu.dot_dimension_numbers<[1], [0], [0], [1], [0, 0, 1, 1], [], []>} : vector<8x32xf32>, vector<32x32xf32>, vector<8x32xf32> -> vector<8x32xf32>
    %cst_71 = arith.constant dense<0.000000e+00> : vector<8x32xf32>
    %273 = tpu.matmul %266, %1, %cst_71 {dimension_numbers = #tpu.dot_dimension_numbers<[1], [0], [0], [1], [0, 0, 1, 1], [], []>} : vector<8x32xf32>, vector<32x32xf32>, vector<8x32xf32> -> vector<8x32xf32>
    %cst_72 = arith.constant dense<0.000000e+00> : vector<8x32xf32>
    %274 = tpu.matmul %266, %2, %cst_72 {dimension_numbers = #tpu.dot_dimension_numbers<[1], [0], [0], [1], [0, 0, 1, 1], [], []>} : vector<8x32xf32>, vector<32x32xf32>, vector<8x32xf32> -> vector<8x32xf32>
    %275 = vector.broadcast %3 : vector<1x32xf32> to vector<8x32xf32>
    %276 = arith.addf %274, %275 : vector<8x32xf32>
    %277 = vector.extract_strided_slice %18 {offsets = [6, 0, 0], sizes = [1, 8, 32], strides = [1, 1, 1]} : vector<8x8x32xf32> to vector<1x8x32xf32>
    %278 = vector.shape_cast %277 : vector<1x8x32xf32> to vector<8x32xf32>
    %279 = arith.addf %278, %272 : vector<8x32xf32>
    %280 = arith.negf %279 : vector<8x32xf32>
    %281 = math.exp %280 : vector<8x32xf32>
    %cst_73 = arith.constant 1.000000e+00 : f32
    %282 = vector.broadcast %cst_73 : f32 to vector<8x32xf32>
    %283 = arith.addf %282, %281 : vector<8x32xf32>
    %284 = arith.divf %282, %283 : vector<8x32xf32>
    %285 = vector.extract_strided_slice %24 {offsets = [6, 0, 0], sizes = [1, 8, 32], strides = [1, 1, 1]} : vector<8x8x32xf32> to vector<1x8x32xf32>
    %286 = vector.shape_cast %285 : vector<1x8x32xf32> to vector<8x32xf32>
    %287 = arith.addf %286, %273 : vector<8x32xf32>
    %288 = arith.negf %287 : vector<8x32xf32>
    %289 = math.exp %288 : vector<8x32xf32>
    %cst_74 = arith.constant 1.000000e+00 : f32
    %290 = vector.broadcast %cst_74 : f32 to vector<8x32xf32>
    %291 = arith.addf %290, %289 : vector<8x32xf32>
    %292 = arith.divf %290, %291 : vector<8x32xf32>
    %293 = vector.extract_strided_slice %30 {offsets = [6, 0, 0], sizes = [1, 8, 32], strides = [1, 1, 1]} : vector<8x8x32xf32> to vector<1x8x32xf32>
    %294 = vector.shape_cast %293 : vector<1x8x32xf32> to vector<8x32xf32>
    %295 = arith.mulf %284, %276 : vector<8x32xf32>
    %296 = arith.addf %294, %295 : vector<8x32xf32>
    %297 = math.tanh %296 : vector<8x32xf32>
    %298 = arith.subf %266, %297 : vector<8x32xf32>
    %299 = arith.mulf %292, %298 : vector<8x32xf32>
    %300 = arith.addf %297, %299 : vector<8x32xf32>
    %301 = vector.extract_strided_slice %10 {offsets = [6, 0, 0], sizes = [1, 8, 1], strides = [1, 1, 1]} : vector<8x8x1xf32> to vector<1x8x1xf32>
    %302 = vector.shape_cast %301 : vector<1x8x1xf32> to vector<8x1xf32>
    %303 = arith.subf %300, %266 : vector<8x32xf32>
    %304 = vector.broadcast %302 : vector<8x1xf32> to vector<8x32xf32>
    %305 = arith.mulf %304, %303 : vector<8x32xf32>
    %306 = arith.addf %266, %305 : vector<8x32xf32>
    %307 = vector.broadcast %302 : vector<8x1xf32> to vector<8x32xf32>
    %308 = arith.mulf %307, %300 : vector<8x32xf32>
    %c6 = arith.constant 6 : index
    %c0_75 = arith.constant 0 : index
    %c0_76 = arith.constant 0 : index
    %309 = vector.load %arg13[%c6, %c0_75, %c0_76] : memref<8x8x32xf32, #tpu.memory_space<vmem>>, vector<1x8x32xf32>
    %310 = vector.shape_cast %309 : vector<1x8x32xf32> to vector<8x32xf32>
    %311 = vector.shape_cast %308 : vector<8x32xf32> to vector<1x8x32xf32>
    tpu.vector_store %arg13[%c6, %c0_75, %c0_76], %311 {strides = array<i32>} : memref<8x8x32xf32, #tpu.memory_space<vmem>>, vector<1x8x32xf32>,
    %cst_77 = arith.constant dense<0.000000e+00> : vector<8x32xf32>
    %312 = tpu.matmul %306, %0, %cst_77 {dimension_numbers = #tpu.dot_dimension_numbers<[1], [0], [0], [1], [0, 0, 1, 1], [], []>} : vector<8x32xf32>, vector<32x32xf32>, vector<8x32xf32> -> vector<8x32xf32>
    %cst_78 = arith.constant dense<0.000000e+00> : vector<8x32xf32>
    %313 = tpu.matmul %306, %1, %cst_78 {dimension_numbers = #tpu.dot_dimension_numbers<[1], [0], [0], [1], [0, 0, 1, 1], [], []>} : vector<8x32xf32>, vector<32x32xf32>, vector<8x32xf32> -> vector<8x32xf32>
    %cst_79 = arith.constant dense<0.000000e+00> : vector<8x32xf32>
    %314 = tpu.matmul %306, %2, %cst_79 {dimension_numbers = #tpu.dot_dimension_numbers<[1], [0], [0], [1], [0, 0, 1, 1], [], []>} : vector<8x32xf32>, vector<32x32xf32>, vector<8x32xf32> -> vector<8x32xf32>
    %315 = vector.broadcast %3 : vector<1x32xf32> to vector<8x32xf32>
    %316 = arith.addf %314, %315 : vector<8x32xf32>
    %317 = vector.extract_strided_slice %18 {offsets = [7, 0, 0], sizes = [1, 8, 32], strides = [1, 1, 1]} : vector<8x8x32xf32> to vector<1x8x32xf32>
    %318 = vector.shape_cast %317 : vector<1x8x32xf32> to vector<8x32xf32>
    %319 = arith.addf %318, %312 : vector<8x32xf32>
    %320 = arith.negf %319 : vector<8x32xf32>
    %321 = math.exp %320 : vector<8x32xf32>
    %cst_80 = arith.constant 1.000000e+00 : f32
    %322 = vector.broadcast %cst_80 : f32 to vector<8x32xf32>
    %323 = arith.addf %322, %321 : vector<8x32xf32>
    %324 = arith.divf %322, %323 : vector<8x32xf32>
    %325 = vector.extract_strided_slice %24 {offsets = [7, 0, 0], sizes = [1, 8, 32], strides = [1, 1, 1]} : vector<8x8x32xf32> to vector<1x8x32xf32>
    %326 = vector.shape_cast %325 : vector<1x8x32xf32> to vector<8x32xf32>
    %327 = arith.addf %326, %313 : vector<8x32xf32>
    %328 = arith.negf %327 : vector<8x32xf32>
    %329 = math.exp %328 : vector<8x32xf32>
    %cst_81 = arith.constant 1.000000e+00 : f32
    %330 = vector.broadcast %cst_81 : f32 to vector<8x32xf32>
    %331 = arith.addf %330, %329 : vector<8x32xf32>
    %332 = arith.divf %330, %331 : vector<8x32xf32>
    %333 = vector.extract_strided_slice %30 {offsets = [7, 0, 0], sizes = [1, 8, 32], strides = [1, 1, 1]} : vector<8x8x32xf32> to vector<1x8x32xf32>
    %334 = vector.shape_cast %333 : vector<1x8x32xf32> to vector<8x32xf32>
    %335 = arith.mulf %324, %316 : vector<8x32xf32>
    %336 = arith.addf %334, %335 : vector<8x32xf32>
    %337 = math.tanh %336 : vector<8x32xf32>
    %338 = arith.subf %306, %337 : vector<8x32xf32>
    %339 = arith.mulf %332, %338 : vector<8x32xf32>
    %340 = arith.addf %337, %339 : vector<8x32xf32>
    %341 = vector.extract_strided_slice %10 {offsets = [7, 0, 0], sizes = [1, 8, 1], strides = [1, 1, 1]} : vector<8x8x1xf32> to vector<1x8x1xf32>
    %342 = vector.shape_cast %341 : vector<1x8x1xf32> to vector<8x1xf32>
    %343 = vector.broadcast %342 : vector<8x1xf32> to vector<8x32xf32>
    %344 = arith.mulf %343, %340 : vector<8x32xf32>
    %c7 = arith.constant 7 : index
    %c0_82 = arith.constant 0 : index
    %c0_83 = arith.constant 0 : index
    %345 = vector.load %arg13[%c7, %c0_82, %c0_83] : memref<8x8x32xf32, #tpu.memory_space<vmem>>, vector<1x8x32xf32>
    %346 = vector.shape_cast %345 : vector<1x8x32xf32> to vector<8x32xf32>
    %347 = vector.shape_cast %344 : vector<8x32xf32> to vector<1x8x32xf32>
    tpu.vector_store %arg13[%c7, %c0_82, %c0_83], %347 {strides = array<i32>} : memref<8x8x32xf32, #tpu.memory_space<vmem>>, vector<1x8x32xf32>,
    return
  }
  func.func @transform_0(%arg0: i32) -> (i32, i32) {
    %c0_i32 = arith.constant 0 : i32
    %c0_i32_0 = arith.constant 0 : i32
    return %arg0, %c0_i32 : i32, i32
  }
  func.func @transform_1(%arg0: i32) -> (i32, i32, i32) {
    %c0_i32 = arith.constant 0 : i32
    %c0_i32_0 = arith.constant 0 : i32
    %c0_i32_1 = arith.constant 0 : i32
    return %c0_i32, %arg0, %c0_i32_0 : i32, i32, i32
  }
  func.func @transform_2(%arg0: i32) -> (i32, i32) {
    %c0_i32 = arith.constant 0 : i32
    %c0_i32_0 = arith.constant 0 : i32
    %c0_i32_1 = arith.constant 0 : i32
    return %c0_i32, %c0_i32_0 : i32, i32
  }
  func.func @transform_3(%arg0: i32) -> (i32, i32) {
    %c0_i32 = arith.constant 0 : i32
    %c0_i32_0 = arith.constant 0 : i32
    %c0_i32_1 = arith.constant 0 : i32
    return %c0_i32, %c0_i32_0 : i32, i32
  }
  func.func @transform_4(%arg0: i32) -> (i32, i32) {
    %c0_i32 = arith.constant 0 : i32
    %c0_i32_0 = arith.constant 0 : i32
    %c0_i32_1 = arith.constant 0 : i32
    return %c0_i32, %c0_i32_0 : i32, i32
  }
  func.func @transform_5(%arg0: i32) -> (i32, i32) {
    %c0_i32 = arith.constant 0 : i32
    %c0_i32_0 = arith.constant 0 : i32
    %c0_i32_1 = arith.constant 0 : i32
    return %c0_i32, %c0_i32_0 : i32, i32
  }
  func.func @transform_6(%arg0: i32) -> (i32, i32) {
    %c0_i32 = arith.constant 0 : i32
    %c0_i32_0 = arith.constant 0 : i32
    %c0_i32_1 = arith.constant 0 : i32
    return %c0_i32, %c0_i32_0 : i32, i32
  }
  func.func @transform_7(%arg0: i32) -> (i32, i32) {
    %c0_i32 = arith.constant 0 : i32
    %c0_i32_0 = arith.constant 0 : i32
    %c0_i32_1 = arith.constant 0 : i32
    return %c0_i32, %c0_i32_0 : i32, i32
  }
  func.func @transform_8(%arg0: i32) -> (i32, i32) {
    %c0_i32 = arith.constant 0 : i32
    %c0_i32_0 = arith.constant 0 : i32
    %c0_i32_1 = arith.constant 0 : i32
    return %c0_i32, %c0_i32_0 : i32, i32
  }
  func.func @transform_9(%arg0: i32) -> (i32, i32) {
    %c0_i32 = arith.constant 0 : i32
    %c0_i32_0 = arith.constant 0 : i32
    %c0_i32_1 = arith.constant 0 : i32
    return %c0_i32, %c0_i32_0 : i32, i32
  }
  func.func @transform_10(%arg0: i32) -> (i32, i32) {
    %c0_i32 = arith.constant 0 : i32
    %c0_i32_0 = arith.constant 0 : i32
    %c0_i32_1 = arith.constant 0 : i32
    return %c0_i32, %c0_i32_0 : i32, i32
  }
  func.func @transform_11(%arg0: i32) -> (i32, i32) {
    %c0_i32 = arith.constant 0 : i32
    %c0_i32_0 = arith.constant 0 : i32
    %c0_i32_1 = arith.constant 0 : i32
    return %c0_i32, %c0_i32_0 : i32, i32
  }
  func.func @transform_12(%arg0: i32) -> (i32, i32, i32) {
    %c0_i32 = arith.constant 0 : i32
    %c0_i32_0 = arith.constant 0 : i32
    %c0_i32_1 = arith.constant 0 : i32
    return %c0_i32, %arg0, %c0_i32_0 : i32, i32, i32
  }
}

</mosaic_0001>

<bundles_post_ra>
// kernel: tpu_custom_call.1
= control target key start
LH: loop header
LB: loop body
LE: loop exit
PB: predicated region body
PF: predicated region fallthrough
CT: control target
= control target key end

     0   :  { %17 = vsyncpa [#allocation3], 0  ;;  %s4058_s0 = inlined_call_operand.vmem [shape: s32[8,1], index: 0, kind: input, shape index: {}]   ;;  %s4059_s1 = inlined_call_operand.hbm [shape: f32[8,8,32], index: 1, kind: input, shape index: {}]   ;;  %s4060_s2 = inlined_call_operand.hbm [shape: f32[32,32], index: 2, kind: input, shape index: {}]   ;;  %s4061_s3 = inlined_call_operand.hbm [shape: f32[32,32], index: 3, kind: input, shape index: {}]   ;;  %s4062_s4 = inlined_call_operand.hbm [shape: f32[32,32], index: 4, kind: input, shape index: {}]   ;;  %s4063_s5 = inlined_call_operand.hbm [shape: f32[32,32], index: 5, kind: input, shape index: {}]   ;;  %s4064_s6 = inlined_call_operand.hbm [shape: f32[32,32], index: 6, kind: input, shape index: {}]   ;;  %s4065_s7 = inlined_call_operand.vmem [shape: f32[32,32], index: 7, kind: input, shape index: {}]   ;;  %s4066_s8 = inlined_call_operand.vmem [shape: f32[1,32], index: 8, kind: input, shape index: {}]   ;;  %s4067_s9 = inlined_call_operand.vmem [shape: f32[1,32], index: 9, kind: input, shape index: {}]   ;;  %s4068_s10 = inlined_call_operand.vmem [shape: f32[1,32], index: 10, kind: input, shape index: {}]   ;;  %s4069_s11 = inlined_call_operand.vmem [shape: f32[1,32], index: 11, kind: input, shape index: {}]   ;;  %s4070_s12 = inlined_call_operand.hbm [shape: f32[8,8,32], index: 12, kind: output, shape index: {}]  }
   0x1   :  { %18 = vsyncpa [#allocation6], 0 }
   0x2   :  { %19 = vsyncpa [#allocation9], 0 }
   0x3   :  { %20 = vsyncpa [#allocation12], 0 }
   0x4   :  { %21 = vsyncpa [#allocation4], 0  ;;  %s3495_s21 = smov [#allocation5]   ;;  %s3496_s23 = smov [#allocation8]  }
   0x5   :  { %s41_s22 = sshll.u32 %s3495_s21, 4  ;;  %s65_s24 = sshll.u32 %s3496_s23, 4  ;;  %s42_s22 = int_to_ptr.vmem [resolvable:$true] %s41_s22  ;;  %s3573_s24 = int_to_ptr.vmem [resolvable:$true] %s65_s24 }
   0x6   :  { %s3331_s27 = scalar_lea.hbm %s4060_s2, 512 }
   0x7   :  { %p3332_p0 = scmp.ne.s32.totalorder %s4060_s2, %s3331_s27  ;;  %p3335_p1 = scmp.lt.u32.totalorder %s3331_s27, %s4060_s2 }
   0x9   :  { %p3337_p2 = pnand %p3335_p1, %p3332_p0 }
   0xb   :  { %3340 = shalt.err (!%p3337_p2)
}
   0xc   :  { %s3341_s14 = scalar_lea.vmem %s42_s22, 512  ;;  %p3346_p4 = scmp.lt.s32.totalorder %s42_s22, %s42_s22 }
   0xd   :  { %p3342_p3 = scmp.ne.s32.totalorder %s42_s22, %s3341_s14  ;;  %p3347_p5 = scmp.lt.s32.totalorder %s3341_s14, %s3341_s14 }
   0xf   :  { %p3348_p6 = por %p3347_p5, %p3346_p4 }
  0x11   :  { %p3349_p7 = pnand %p3348_p6, %p3342_p3 }
  0x13   :  { %3352 = shalt.err (!%p3349_p7)
}
  0x14   :  { %s3497_s15 = smov 128   ;;  %s3498_s16 = smov 8  }
  0x15   :  { %47 = dma.hbm_to_vmem [thread:$0]  %s4060_s2, 512, %s42_s22, [#allocation6], %s3497_s15, %s3497_s15, %s3498_s16  }
  0x16   :  { %s3353_s21 = scalar_lea.hbm %s4062_s4, 512 }
  0x17   :  { %p3354_p8 = scmp.ne.s32.totalorder %s4062_s4, %s3353_s21  ;;  %p3357_p9 = scmp.lt.u32.totalorder %s3353_s21, %s4062_s4 }
  0x19   :  { %p3359_p10 = pnand %p3357_p9, %p3354_p8 }
  0x1b   :  { %3362 = shalt.err (!%p3359_p10)
}
  0x1c   :  { %s3363_s28 = scalar_lea.vmem %s3573_s24, 512  ;;  %p3368_p12 = scmp.lt.s32.totalorder %s3573_s24, %s3573_s24 }
  0x1d   :  { %p3364_p11 = scmp.ne.s32.totalorder %s3573_s24, %s3363_s28  ;;  %p3369_p13 = scmp.lt.s32.totalorder %s3363_s28, %s3363_s28 }
  0x1f   :  { %p3370_p0 = por %p3369_p13, %p3368_p12 }
  0x21   :  { %p3371_p1 = pnand %p3370_p0, %p3364_p11 }
  0x23   :  { %3374 = shalt.err (!%p3371_p1)
}
  0x24   :  { %71 = dma.hbm_to_vmem [thread:$0]  %s4062_s4, 512, %s3573_s24, [#allocation9], %s3497_s15, %s3497_s15, %s3498_s16  }
  0x25   :  { %s3499_s29 = smov [#allocation2]   ;;  %s3500_s13 = smov [#allocation7]  }
  0x26   :  { %s29_s30 = sshll.u32 %s3499_s29, 4  ;;  %s53_s14 = sshll.u32 %s3500_s13, 4  ;;  %s30_s30 = int_to_ptr.vmem [resolvable:$true] %s29_s30  ;;  %s3610_s14 = int_to_ptr.vmem [resolvable:$true] %s53_s14 }
  0x27   :  { %s3375_s19 = scalar_lea.hbm %s4059_s1, 1024 }
  0x28   :  { %p3376_p2 = scmp.ne.s32.totalorder %s4059_s1, %s3375_s19  ;;  %p3379_p3 = scmp.lt.u32.totalorder %s3375_s19, %s4059_s1 }
  0x2a   :  { %p3381_p4 = pnand %p3379_p3, %p3376_p2 }
  0x2c   :  { %3384 = shalt.err (!%p3381_p4)
}
  0x2d   :  { %s3385_s4 = scalar_lea.vmem %s30_s30, 1024  ;;  %p3390_p6 = scmp.lt.s32.totalorder %s30_s30, %s30_s30 }
  0x2e   :  { %p3386_p5 = scmp.ne.s32.totalorder %s30_s30, %s3385_s4  ;;  %p3391_p7 = scmp.lt.s32.totalorder %s3385_s4, %s3385_s4 }
  0x30   :  { %p3392_p8 = por %p3391_p7, %p3390_p6 }
  0x32   :  { %p3393_p9 = pnand %p3392_p8, %p3386_p5 }
  0x34   :  { %3396 = shalt.err (!%p3393_p9)
}
  0x35   :  { %35 = dma.hbm_to_vmem [thread:$0]  %s4059_s1, 1024, %s30_s30, [#allocation3], %s3497_s15, %s3497_s15, %s3498_s16  }
  0x36   :  { %s3397_s2 = scalar_lea.hbm %s4061_s3, 512 }
  0x37   :  { %p3398_p10 = scmp.ne.s32.totalorder %s4061_s3, %s3397_s2  ;;  %p3401_p11 = scmp.lt.u32.totalorder %s3397_s2, %s4061_s3 }
  0x39   :  { %p3403_p12 = pnand %p3401_p11, %p3398_p10 }
  0x3b   :  { %3406 = shalt.err (!%p3403_p12)
}
  0x3c   :  { %s3407_s18 = scalar_lea.vmem %s3610_s14, 512  ;;  %p3412_p0 = scmp.lt.s32.totalorder %s3610_s14, %s3610_s14 }
  0x3d   :  { %p3408_p13 = scmp.ne.s32.totalorder %s3610_s14, %s3407_s18  ;;  %p3413_p1 = scmp.lt.s32.totalorder %s3407_s18, %s3407_s18 }
  0x3f   :  { %p3414_p2 = por %p3413_p1, %p3412_p0 }
  0x41   :  { %p3415_p3 = pnand %p3414_p2, %p3408_p13 }
  0x43   :  { %3418 = shalt.err (!%p3415_p3)
}
  0x44   :  { %59 = dma.hbm_to_vmem [thread:$0]  %s4061_s3, 512, %s3610_s14, [#allocation6], %s3497_s15, %s3497_s15, %s3498_s16  }
  0x45   :  { %s3501_s19 = smov [#allocation10]   ;;  %s3502_s21 = smov [#allocation11]  }
  0x46   :  { %s77_s20 = sshll.u32 %s3501_s19, 4  ;;  %s89_s23 = sshll.u32 %s3502_s21, 4  ;;  %s78_s20 = int_to_ptr.vmem [resolvable:$true] %s77_s20  ;;  %s3647_s23 = int_to_ptr.vmem [resolvable:$true] %s89_s23 }
  0x47   :  { %s3419_s24 = scalar_lea.hbm %s4063_s5, 512 }
  0x48   :  { %p3420_p4 = scmp.ne.s32.totalorder %s4063_s5, %s3419_s24  ;;  %p3423_p5 = scmp.lt.u32.totalorder %s3419_s24, %s4063_s5 }
  0x4a   :  { %p3425_p6 = pnand %p3423_p5, %p3420_p4 }
  0x4c   :  { %3428 = shalt.err (!%p3425_p6)
}
  0x4d   :  { %s3429_s3 = scalar_lea.vmem %s78_s20, 512  ;;  %p3434_p8 = scmp.lt.s32.totalorder %s78_s20, %s78_s20 }
  0x4e   :  { %p3430_p7 = scmp.ne.s32.totalorder %s78_s20, %s3429_s3  ;;  %p3435_p9 = scmp.lt.s32.totalorder %s3429_s3, %s3429_s3 }
  0x50   :  { %p3436_p10 = por %p3435_p9, %p3434_p8 }
  0x52   :  { %p3437_p11 = pnand %p3436_p10, %p3430_p7 }
  0x54   :  { %3440 = shalt.err (!%p3437_p11)
}
  0x55   :  { %83 = dma.hbm_to_vmem [thread:$0]  %s4063_s5, 512, %s78_s20, [#allocation9], %s3497_s15, %s3497_s15, %s3498_s16  }
  0x56   :  { %s3441_s17 = scalar_lea.hbm %s4064_s6, 512 }
  0x57   :  { %p3442_p12 = scmp.ne.s32.totalorder %s4064_s6, %s3441_s17  ;;  %p3445_p13 = scmp.lt.u32.totalorder %s3441_s17, %s4064_s6 }
  0x59   :  { %p3447_p0 = pnand %p3445_p13, %p3442_p12 }
  0x5b   :  { %3450 = shalt.err (!%p3447_p0)
}
  0x5c   :  { %s3451_s21 = scalar_lea.vmem %s3647_s23, 512  ;;  %p3456_p2 = scmp.lt.s32.totalorder %s3647_s23, %s3647_s23 }
  0x5d   :  { %p3452_p1 = scmp.ne.s32.totalorder %s3647_s23, %s3451_s21  ;;  %p3457_p3 = scmp.lt.s32.totalorder %s3451_s21, %s3451_s21 }
  0x5f   :  { %p3458_p4 = por %p3457_p3, %p3456_p2 }
  0x61   :  { %p3459_p5 = pnand %p3458_p4, %p3452_p1 }
  0x63   :  { %3462 = shalt.err (!%p3459_p5)
}
  0x64   :  { %95 = dma.hbm_to_vmem [thread:$0]  %s4064_s6, 512, %s3647_s23, [#allocation12], %s3497_s15, %s3497_s15, %s3498_s16  }
  0x65   :  { %3485 = dma.done.wait [#allocation3], 1024  }
  0x66   :  { %3486 = vsyncadd [#allocation3], 4294966272 }
  0x67   :  { %3487 = dma.done.wait [#allocation6], 1024  }
  0x68   :  { %3488 = vsyncadd [#allocation6], 4294966272 }
  0x69   :  { %3489 = dma.done.wait [#allocation9], 1024  }
  0x6a   :  { %3490 = vsyncadd [#allocation9], 4294966272 }
  0x6b   :  { %3491 = dma.done.wait [#allocation12], 512  }
  0x6c   :  { %3492 = vsyncadd [#allocation12], 4294966784  ;;  %v3503_v0 = vmov 0   ;;  %vm181_vm0 = vcmask 261120   ;;  %v311_v1 = vld [vmem:[#allocation7] sm:$0xff]  ;;  %v312_v2 = vld [vmem:[#allocation7 + $0x8] sm:$0xff] }
  0x6d   :  { %3249 = vset.pattern.permute.xlu0 %v3503_v0  ;;  %3250 = vset.pattern.permute.xlu1 %v3503_v0  ;;  %v313_v3 = vld [vmem:[#allocation7 + $0x10] sm:$0xff]  ;;  %v3076_v4 = vpack.c.bf16 %v312_v2, %v311_v1  ;;  %v314_v5 = vld [vmem:[#allocation7 + $0x18] sm:$0xff]  ;;  %v3684_v6 = vld [vmem:[#allocation2] sm:$0xff]  ;;  %v3504_v20 = vmov 0.0|0.0   ;;  %v3505_v30 = vmov 0.0   ;;  %vm3506_vm5 = vmmov 0  }
  0x6e   :  { %v3080_v7 = vpack.c.bf16 %v314_v5, %v313_v3  ;;  %2772 = vmatprep.mubr.msk.f32.mxu1 %vm181_vm0, %v3684_v6  ;;  %v170_v8 = vld [vmem:[#allocation5] sm:$0xff]  ;;  %2752 = vmatprep.mubr.msk.f32.mxu0 %vm181_vm0, %v3684_v6  ;;  %v171_v9 = vld [vmem:[#allocation5 + $0x8] sm:$0xff]  ;;  %v172_v11 = vld [vmem:[#allocation5 + $0x10] sm:$0xff] }
  0x6f   :  { %3077 = vmatprep.subr.bf16.mxu1 %v3076_v4  ;;  %v3068_v10 = vpack.c.bf16 %v171_v9, %v170_v8  ;;  %v173_v12 = vld [vmem:[#allocation5 + $0x18] sm:$0xff]  ;;  %v124_v13 = vld [vmem:[#allocation10] sm:$0xff]  ;;  %v125_v14 = vld [vmem:[#allocation10 + $0x8] sm:$0xff] }
  0x70   :  { %3079 = vmatpush3.bf16.msra.mxu1 %v3076_v4  ;;  %v3072_v15 = vpack.c.bf16 %v173_v12, %v172_v11  ;;  %v427_v16 = vld [vmem:[#allocation8] sm:$0xff]  ;;  %v428_v17 = vld [vmem:[#allocation8 + $0x8] sm:$0xff]  ;;  %v3692_v19 = vpack.c.bf16 %v125_v14, %v124_v13  ;;  %v3695_v21 = vld [vmem:[#allocation2 + $0x10] sm:$0xff] }
  0x71   :  { %3081 = vmatprep.subr.bf16.mxu1 %v3080_v7  ;;  %3069 = vmatprep.subr.bf16.mxu0 %v3068_v10  ;;  %v3690_v18 = vld [vmem:[#allocation2 + $0x8] sm:$0xff]  ;;  %v126_v22 = vld [vmem:[#allocation10 + $0x10] sm:$0xff]  ;;  %v127_v23 = vld [vmem:[#allocation10 + $0x18] sm:$0xff]  ;;  %v3084_v24 = vpack.c.bf16 %v428_v17, %v427_v16 }
  0x72   :  { %3071 = vmatpush3.bf16.msra.mxu0 %v3068_v10  ;;  %v3700_v25 = vld [vmem:[%s4058_s0] sm:$0xff]  ;;  %v429_v26 = vld [vmem:[#allocation8 + $0x10] sm:$0xff]  ;;  %v3710_v29 = vpack.c.bf16 %v127_v23, %v126_v22  ;;  %v166_v32 = vld [vmem:[#allocation2 + $0x20] sm:$0xff] }
  0x73   :  { %3073 = vmatprep.subr.bf16.mxu0 %v3072_v15  ;;  %v430_v27 = vld [vmem:[#allocation8 + $0x18] sm:$0xff]  ;;  %vm138_vm1 = vcmp.gt.s32.totalorder %v3700_v25, 0  ;;  %vm139_vm2 = vcmp.gt.s32.totalorder %v3700_v25, 1  ;;  %v167_v34 = vld [vmem:[#allocation2 + $0x28] sm:$0xff]  ;;  %v168_v35 = vld [vmem:[#allocation2 + $0x30] sm:$0xff]  ;;  %vm142_vm3 = vcmp.gt.s32.totalorder %v3700_v25, 4 }
  0x74   :  { %3083 = vmatpush3.bf16.msra.mxu1 %v3080_v7  ;;  %v3708_v28 = vld [vmem:[#allocation2 + $0x18] sm:$0xff]  ;;  %v2515_v31 = vsel %vm138_vm1, 1.0, %v3505_v30  ;;  %v3088_v33 = vpack.c.bf16 %v430_v27, %v429_v26  ;;  %v2516_v36 = vsel %vm139_vm2, 1.0, %v3505_v30  ;;  %v128_v38 = vld [vmem:[#allocation11] sm:$0xff]  ;;  %v129_v39 = vld [vmem:[#allocation11 + $0x8] sm:$0xff]  ;;  %v2519_v40 = vsel %vm142_vm3, 1.0, %v3505_v30 }
  0x75   :  { %3092 = vmatprep.subr.bf16.mxu1 %v3504_v20  ;;  %784 = vperm.xlu0 %3249, %v2515_v31   ;;  %v169_v37 = vld [vmem:[#allocation2 + $0x38] sm:$0xff]  ;;  %vm144_vm4 = vcmp.gt.s32.totalorder %v3700_v25, 6  ;;  %v3739_v41 = vpack.c.bf16 %v129_v39, %v128_v38  ;;  %v133_v43 = vld [vmem:[%s4065_s7 + $0x8] sm:$0xff]  ;;  %v130_v44 = vld [vmem:[#allocation11 + $0x10] sm:$0xff]  ;;  %vm140_vm6 = vcmp.gt.s32.totalorder %v3700_v25, 2  ;;  %vm141_vm7 = vcmp.gt.s32.totalorder %v3700_v25, 3 }
  0x76   :  { %3075 = vmatpush3.bf16.msra.mxu0 %v3072_v15  ;;  %v132_v42 = vld [vmem:[%s4065_s7] sm:$0xff]  ;;  %v2521_v46 = vsel %vm144_vm4, 1.0, %v3505_v30  ;;  %v134_v49 = vld [vmem:[%s4065_s7 + $0x10] sm:$0xff]  ;;  %v135_v50 = vld [vmem:[%s4065_s7 + $0x18] sm:$0xff]  ;;  %vm143_vm8 = vcmp.gt.s32.totalorder %v3700_v25, 5  ;;  %vm145_vm9 = vcmp.gt.s32.totalorder %v3700_v25, 7 }
  0x77   :  { %2773 = vmatmul.mubr.msk.f32.vlgmr.msra.gmra.mrb[0].mxu1 %vm181_vm0, %v3690_v18  ;;  %3085 = vmatprep.subr.bf16.mxu0 %v3084_v24  ;;  %v131_v45 = vld [vmem:[#allocation11 + $0x18] sm:$0xff]  ;;  %v3752_v47 = vpack.c.bf16 %v133_v43, %v132_v42  ;;  %v3773_v51 = vpack.c.bf16 %v135_v50, %v134_v49 }
  0x78   :  { %3094 = vmatpush3.bf16.msra.mxu1 %v3692_v19  ;;  %2775 = vmatprep.mubr.msk.f32.mxu1 %vm181_vm0, %v3695_v21  ;;  %v3755_v48 = vpack.c.bf16 %v131_v45, %v130_v44  ;;  %v2532_v52 = vld [vmem:[%s4067_s9] ss:$0 sm:$0xff] }
  0x79   :  { %3095 = vmatprep.subr.bf16.mxu1 %v3504_v20  ;;  %2753 = vmatmul.mubr.msk.f32.vlgmr.msra.gmra.mrb[0].mxu0 %vm181_vm0, %v3690_v18  ;;  %v2523_v56 = vld [vmem:[%s4066_s8] ss:$0 sm:$0xff] }
  0x7a   :  { %3087 = vmatpush3.bf16.msra.mxu0 %v3084_v24  ;;  %2755 = vmatprep.mubr.msk.f32.mxu0 %vm181_vm0, %v3695_v21  ;;  %v2541_v27 = vld [vmem:[%s4068_s10] ss:$0 sm:$0xff] }
  0x7b   :  { %2776 = vmatmul.mubr.msk.f32.gmra.mrb[2].mxu1 %vm181_vm0, %v3708_v28  ;;  %3089 = vmatprep.subr.bf16.mxu0 %v3088_v33 }
  0x7c   :  { %2778 = vmatprep.mubr.msk.f32.mxu1 %vm181_vm0, %v166_v32  ;;  %3097 = vmatpush3.bf16.msra.mxu1 %v3710_v29 }
  0x7d   :  { %3098 = vmatprep.subr.bf16.mxu1 %v3504_v20  ;;  %2756 = vmatmul.mubr.msk.f32.gmra.mrb[2].mxu0 %vm181_vm0, %v3708_v28 }
  0x7e   :  { %2758 = vmatprep.mubr.msk.f32.mxu0 %vm181_vm0, %v166_v32  ;;  %3091 = vmatpush3.bf16.msra.mxu0 %v3088_v33 }
  0x7f   :  { %2779 = vmatmul.mubr.msk.f32.gmra.mrb[4].mxu1 %vm181_vm0, %v167_v34  ;;  %3104 = vmatprep.subr.bf16.mxu0 %v3504_v20 }
  0x80   :  { %2781 = vmatprep.mubr.msk.f32.mxu1 %vm181_vm0, %v168_v35  ;;  %1026 = vperm.xlu0 %3249, %v2516_v36  }
  0x81   :  { %2759 = vmatmul.mubr.msk.f32.gmra.mrb[4].mxu0 %vm181_vm0, %v167_v34 }
  0x82   :  { %2761 = vmatprep.mubr.msk.f32.mxu0 %vm181_vm0, %v168_v35 }
  0x83   :  { %2782 = vmatmul.mubr.msk.f32.gmra.mrb[6].mxu1 %vm181_vm0, %v169_v37 }
  0x84   :  { %2812 = vmatprep.mubr.msk.f32.mxu1 %vm3506_vm5, %v3505_v30  ;;  %1758 = vperm.xlu0 %3249, %v2519_v40  }
  0x85   :  { %2762 = vmatmul.mubr.msk.f32.gmra.mrb[6].mxu0 %vm181_vm0, %v169_v37 }
  0x86   :  { %2792 = vmatprep.mubr.msk.f32.mxu0 %vm181_vm0, %v3684_v6 }
  0x87   :  { %2813 = vmatmul.mubr.f32.vlgmr.msra.gmra.mrb[8].mxu1 %v3505_v30 }
  0x88   :  { %3100 = vmatpush3.bf16.msra.mxu1 %v3739_v41  ;;  %2823 = vmatprep.mubr.msk.f32.mxu1 %vm3506_vm5, %v3505_v30 }
  0x89   :  { %3101 = vmatprep.subr.bf16.mxu1 %v3504_v20  ;;  %2246 = vperm.xlu0 %3249, %v2521_v46  }
  0x8a   :  { %2793 = vmatmul.mubr.msk.f32.vlgmr.msra.gmra.mrb[8].mxu0 %vm181_vm0, %v3690_v18 }
  0x8b   :  { %3106 = vmatpush3.bf16.msra.mxu0 %v3752_v47  ;;  %2795 = vmatprep.mubr.msk.f32.mxu0 %vm181_vm0, %v3695_v21 }
  0x8c   :  { %3103 = vmatpush3.bf16.msra.mxu1 %v3755_v48  ;;  %3107 = vmatprep.subr.bf16.mxu0 %v3504_v20 }
  0x8d   :  { %3110 = vmatprep.subr.bf16.mxu1 %v3504_v20 }
  0x8e   :  { %2796 = vmatmul.mubr.msk.f32.gmra.mrb[10].mxu0 %vm181_vm0, %v3708_v28 }
  0x8f   :  { %2824 = vmatmul.mubr.f32.vlgmr.msra.gmra.mrb[10].mxu1 %v3505_v30  ;;  %2798 = vmatprep.mubr.msk.f32.mxu0 %vm181_vm0, %v166_v32 }
  0x90   :  { %3109 = vmatpush3.bf16.msra.mxu0 %v3773_v51  ;;  %3112 = vmatpush3.bf16.msra.mxu1 %v3692_v19 }
  0x91   :  { %3116 = vmatprep.subr.bf16.mxu0 %v3504_v20  ;;  %3113 = vmatprep.subr.bf16.mxu1 %v3504_v20 }
  0x92   :  { %2799 = vmatmul.mubr.msk.f32.gmra.mrb[12].mxu0 %vm181_vm0, %v167_v34  ;;  %2845 = vmatprep.mubr.msk.f32.mxu1 %vm3506_vm5, %v3505_v30 }
  0x93   :  { %2801 = vmatprep.mubr.msk.f32.mxu0 %vm181_vm0, %v168_v35 }
  0x94   :  { %3115 = vmatpush3.bf16.msra.mxu1 %v3710_v29 }
  0x95   :  { %3122 = vmatprep.subr.bf16.mxu1 %v3504_v20 }
  0x96   :  { %2802 = vmatmul.mubr.msk.f32.gmra.mrb[14].mxu0 %vm181_vm0, %v169_v37 }
  0x97   :  { %2834 = vmatprep.mubr.msk.f32.mxu0 %vm3506_vm5, %v3505_v30 }
  0x9a   :  { %2835 = vmatmul.mubr.f32.vlgmr.msra.gmra.mrb[16].mxu0 %v3505_v30 }
  0x9b   :  { %3118 = vmatpush3.bf16.msra.mxu0 %v3739_v41  ;;  %2856 = vmatprep.mubr.msk.f32.mxu0 %vm3506_vm5, %v3505_v30 }
  0x9c   :  { %3119 = vmatprep.subr.bf16.mxu0 %v3504_v20 }
  0x9f   :  { %3121 = vmatpush3.bf16.msra.mxu0 %v3755_v48 }
  0xa0   :  { %3128 = vmatprep.subr.bf16.mxu0 %v3504_v20 }
 0x14a   :  { %v2774_v53 = vpop.f32.mrb[0].mxu1 }
 0x14b   :  { %v3803_v54 = vadd.f32 %v2774_v53, %v2532_v52  ;;  %v388_v55 = vpop.f32.mrb[1].mxu1 }
 0x14c   :  { %v2754_v57 = vpop.f32.mrb[0].mxu0  ;;  %v389_v34 = vadd.f32 %v2532_v52, %v388_v55 }
 0x14d   :  { %v3808_v59 = vadd.f32 %v2754_v57, %v2523_v56  ;;  %v272_v60 = vpop.f32.mrb[1].mxu0 }
 0x14e   :  { %v2777_v58 = vpop.f32.mrb[2].mxu1  ;;  %v273_v16 = vadd.f32 %v2523_v56, %v272_v60 }
 0x14f   :  { %v3810_v61 = vadd.f32 %v2777_v58, %v2532_v52  ;;  %v398_v62 = vpop.f32.mrb[3].mxu1 }
 0x150   :  { %v3812_v63 = vadd.f32 %v2532_v52, %v398_v62  ;;  %v2757_v0 = vpop.f32.mrb[2].mxu0  ;;  %v3854_v62 = vld [vmem:[%s4069_s11] ss:$0 sm:$0xff]  ;;  %s3507_s11 = smov [#allocation13]  }
 0x151   :  { %v3814_v2 = vadd.f32 %v2757_v0, %v2523_v56  ;;  %v282_v3 = vpop.f32.mrb[3].mxu0  ;;  %s2500_s13 = sshll.u32 %s3507_s11, 4  ;;  %s2501_s13 = int_to_ptr.vmem [resolvable:$true] %s2500_s13 }
 0x152   :  { %v2780_v1 = vpop.f32.mrb[4].mxu1  ;;  %v3818_v6 = vadd.f32 %v2523_v56, %v282_v3  ;;  %s3463_s17 = scalar_lea.vmem %s2501_s13, 1024  ;;  %p3468_p7 = scmp.lt.s32.totalorder %s2501_s13, %s2501_s13 }
 0x153   :  { %v3816_v4 = vadd.f32 %v2780_v1, %v2532_v52  ;;  %v408_v5 = vpop.f32.mrb[5].mxu1  ;;  %p3464_p6 = scmp.ne.s32.totalorder %s2501_s13, %s3463_s17  ;;  %p3469_p8 = scmp.lt.s32.totalorder %s3463_s17, %s3463_s17 }
 0x154   :  { %v3820_v7 = vadd.f32 %v2532_v52, %v408_v5  ;;  %v2760_v8 = vpop.f32.mrb[4].mxu0 }
 0x155   :  { %v3822_v10 = vadd.f32 %v2760_v8, %v2523_v56  ;;  %v292_v11 = vpop.f32.mrb[5].mxu0  ;;  %p3470_p9 = por %p3469_p8, %p3468_p7 }
 0x156   :  { %v2783_v9 = vpop.f32.mrb[6].mxu1  ;;  %v3826_v14 = vadd.f32 %v2523_v56, %v292_v11 }
 0x157   :  { %v3824_v12 = vadd.f32 %v2783_v9, %v2532_v52  ;;  %v418_v13 = vpop.f32.mrb[7].mxu1  ;;  %p3471_p10 = pnand %p3470_p9, %p3464_p6 }
 0x158   :  { %v3828_v15 = vadd.f32 %v2532_v52, %v418_v13  ;;  %v2763_v17 = vpop.f32.mrb[6].mxu0 }
 0x159   :  { %v3830_v21 = vadd.f32 %v2763_v17, %v2523_v56  ;;  %v302_v22 = vpop.f32.mrb[7].mxu0 }
 0x15a   :  { %v612_v18 = vpop.f32.mrb[8].mxu1  ;;  %v3832_v26 = vadd.f32 %v2523_v56, %v302_v22 }
 0x15b   :  { %v762_v23 = vadd.f32 %v612_v18, %v273_v16  ;;  %v2814_v24 = vpop.f32.mrb[9].mxu1 }
 0x15d   :  { %v2551_v28 = vmul.f32 -1.442695, %v762_v23  ;;  %v2794_v31 = vpop.f32.mrb[8].mxu0  ;;  %v785_v23 = vpop.permute.xlu0 %784 }
 0x15e   :  { %v3837_v32 = vadd.f32 %v2794_v31, %v2541_v27  ;;  %v504_v33 = vpop.f32.mrb[9].mxu0  ;;  %v2520_v31 = vsel %vm143_vm8, 1.0, %v3505_v30 }
 0x15f   :  { %3251 = vpow2.f32 %v2551_v28  ;;  %v505_v5 = vadd.f32 %v2541_v27, %v504_v33  ;;  %v2518_v28 = vsel %vm141_vm7, 1.0, %v3505_v30  ;;  %v2522_v33 = vsel %vm145_vm9, 1.0, %v3505_v30 }
 0x161   :  { %v2797_v35 = vpop.f32.mrb[10].mxu0 }
 0x162   :  { %v682_v36 = vpop.f32.mrb[10].mxu1  ;;  %v3839_v37 = vadd.f32 %v2797_v35, %v2541_v27  ;;  %v514_v38 = vpop.f32.mrb[11].mxu0 }
 0x163   :  { %v769_v39 = vadd.f32 %v682_v36, %v389_v34  ;;  %v3841_v40 = vadd.f32 %v2541_v27, %v514_v38  ;;  %v2825_v42 = vpop.f32.mrb[11].mxu1 }
 0x165   :  { %v2800_v43 = vpop.f32.mrb[12].mxu0  ;;  %v2552_v46 = vmul.f32 -1.442695, %v769_v39 }
 0x166   :  { %v3843_v44 = vadd.f32 %v2800_v43, %v2541_v27  ;;  %v524_v45 = vpop.f32.mrb[13].mxu0 }
 0x167   :  { %v3845_v49 = vadd.f32 %v2541_v27, %v524_v45  ;;  %3253 = vpow2.f32 %v2552_v46 }
 0x169   :  { %v3252_v50 = vpop.eup %3251  ;;  %v2803_v53 = vpop.f32.mrb[14].mxu0 }
 0x16a   :  { %v766_v56 = vadd.f32 1.0, %v3252_v50  ;;  %v3847_v52 = vadd.f32 %v2803_v53, %v2541_v27  ;;  %v534_v55 = vpop.f32.mrb[15].mxu0 }
 0x16b   :  { %v3849_v57 = vadd.f32 %v2541_v27, %v534_v55  ;;  %v2517_v27 = vsel %vm140_vm6, 1.0, %v3505_v30 }
 0x16c   :  { %3255 = vrcp.f32 %v766_v56  ;;  %1270 = vperm.xlu1 %3250, %v2517_v27  }
 0x16d   :  { %v758_v58 = vpop.f32.mrb[16].mxu0 }
 0x16e   :  { %v2836_v60 = vpop.f32.mrb[17].mxu0  ;;  %v759_v0 = vadd.f32 %v3854_v62, %v758_v58 }
 0x170   :  { %1514 = vperm.xlu1 %3250, %v2518_v28  }
 0x171   :  { %v3254_v1 = vpop.eup %3253 }
 0x172   :  { %v773_v9 = vadd.f32 1.0, %v3254_v1 }
 0x174   :  { %2002 = vperm.xlu1 %3250, %v2520_v31  }
 0x176   :  { %v3256_v3 = vpop.eup %3255 }
 0x177   :  { %v776_v8 = vmul.f32 %v3256_v3, %v759_v0 }
 0x178   :  { %2489 = vperm.xlu1 %3250, %v2522_v33  }
 0x179   :  { %v777_v11 = vadd.f32 %v776_v8, %v505_v5 }
 0x17b   :  { %3257 = vtanh.f32 %v777_v11 }
 0x17c   :  { %3259 = vrcp.f32 %v773_v9  ;;  %v1027_v9 = vpop.permute.xlu0 %1026 }
 0x185   :  { %v3258_v13 = vpop.eup %3257 }
 0x186   :  { %v779_v16 = vsub.f32 0.0, %v3258_v13  ;;  %v3260_v17 = vpop.eup %3259 }
 0x188   :  { %v780_v18 = vmul.f32 %v3260_v17, %v779_v16 }
 0x18a   :  { %v781_v22 = vadd.f32 %v3258_v13, %v780_v18 }
 0x18c   :  { %v3857_v24 = vmul.f32 %v785_v23, %v781_v22 }
 0x18e   :  { %789 = vst.msk [vmem:[#allocation13] sm:$0xff] %vm181_vm0, %v3857_v24  ;;  %2846 = vmatmul.mubr.msk.f32.vlgmr.msra.gmra.mrb[12].mxu1 %vm181_vm0, %v3857_v24  ;;  %2857 = vmatmul.mubr.msk.f32.vlgmr.msra.gmra.mrb[18].mxu0 %vm181_vm0, %v3857_v24 }
 0x18f   :  { %3124 = vmatpush3.bf16.msra.mxu1 %v3752_v47  ;;  %2867 = vmatprep.mubr.msk.f32.mxu1 %vm3506_vm5, %v3505_v30 }
 0x190   :  { %3125 = vmatprep.subr.bf16.mxu1 %v3504_v20  ;;  %3130 = vmatpush3.bf16.msra.mxu0 %v3692_v19 }
 0x191   :  { %3131 = vmatprep.subr.bf16.mxu0 %v3504_v20  ;;  %2878 = vmatprep.mubr.msk.f32.mxu0 %vm3506_vm5, %v3505_v30 }
 0x193   :  { %3127 = vmatpush3.bf16.msra.mxu1 %v3773_v51 }
 0x194   :  { %3134 = vmatprep.subr.bf16.mxu1 %v3504_v20  ;;  %3133 = vmatpush3.bf16.msra.mxu0 %v3710_v29 }
 0x195   :  { %3140 = vmatprep.subr.bf16.mxu0 %v3504_v20 }
 0x196   :  { %2868 = vmatmul.mubr.msk.f32.vlgmr.msra.gmra.mrb[14].mxu1 %vm181_vm0, %v3857_v24 }
 0x197   :  { %3136 = vmatpush3.bf16.msra.mxu1 %v3739_v41  ;;  %2889 = vmatprep.mubr.msk.f32.mxu1 %vm3506_vm5, %v3505_v30 }
 0x198   :  { %3137 = vmatprep.subr.bf16.mxu1 %v3504_v20 }
 0x19b   :  { %3139 = vmatpush3.bf16.msra.mxu1 %v3755_v48 }
 0x19c   :  { %3146 = vmatprep.subr.bf16.mxu1 %v3504_v20 }
 0x261   :  { %v859_v34 = vpop.f32.mrb[12].mxu1  ;;  %v929_v35 = vpop.f32.mrb[18].mxu0 }
 0x262   :  { %v1003_v36 = vadd.f32 %v859_v34, %v3808_v59  ;;  %v1010_v38 = vadd.f32 %v929_v35, %v3803_v54  ;;  %v2847_v39 = vpop.f32.mrb[13].mxu1  ;;  %v2858_v42 = vpop.f32.mrb[19].mxu0 }
 0x264   :  { %v2556_v43 = vmul.f32 -1.442695, %v1003_v36  ;;  %v2557_v50 = vmul.f32 -1.442695, %v1010_v38 }
 0x266   :  { %3261 = vpow2.f32 %v2556_v43 }
 0x267   :  { %3263 = vpow2.f32 %v2557_v50 }
 0x269   :  { %v999_v45 = vpop.f32.mrb[14].mxu1 }
 0x26a   :  { %v2869_v46 = vpop.f32.mrb[15].mxu1  ;;  %v1000_v55 = vadd.f32 %v3854_v62, %v999_v45 }
 0x270   :  { %v3262_v53 = vpop.eup %3261 }
 0x271   :  { %v1007_v56 = vadd.f32 1.0, %v3262_v53  ;;  %v3264_v25 = vpop.eup %3263 }
 0x272   :  { %v1014_v0 = vadd.f32 1.0, %v3264_v25  ;;  %v1271_v25 = vpop.permute.xlu1 %1270 }
 0x273   :  { %3265 = vrcp.f32 %v1007_v56 }
 0x27d   :  { %v3266_v58 = vpop.eup %3265 }
 0x27e   :  { %v1017_v60 = vmul.f32 %v3266_v58, %v1000_v55 }
 0x280   :  { %v1018_v59 = vadd.f32 %v1017_v60, %v3837_v32 }
 0x282   :  { %3267 = vtanh.f32 %v1018_v59 }
 0x283   :  { %3269 = vrcp.f32 %v1014_v0 }
 0x28c   :  { %v3268_v54 = vpop.eup %3267 }
 0x28d   :  { %v1020_v1 = vsub.f32 %v3857_v24, %v3268_v54  ;;  %v3270_v3 = vpop.eup %3269 }
 0x28f   :  { %v1021_v5 = vmul.f32 %v3270_v3, %v1020_v1 }
 0x291   :  { %v1022_v8 = vadd.f32 %v3268_v54, %v1021_v5 }
 0x293   :  { %v1023_v11 = vsub.f32 %v1022_v8, %v3857_v24  ;;  %v1031_v13 = vmul.f32 %v1027_v9, %v1022_v8 }
 0x295   :  { %1033 = vst.msk [vmem:[#allocation13 + $0x8] sm:$0xff] %vm181_vm0, %v1031_v13  ;;  %v1029_v16 = vmul.f32 %v1027_v9, %v1023_v11 }
 0x297   :  { %v1030_v17 = vadd.f32 %v1029_v16, %v3857_v24 }
 0x299   :  { %2879 = vmatmul.mubr.msk.f32.vlgmr.msra.gmra.mrb[20].mxu0 %vm181_vm0, %v1030_v17  ;;  %2890 = vmatmul.mubr.msk.f32.vlgmr.msra.gmra.mrb[16].mxu1 %vm181_vm0, %v1030_v17 }
 0x29a   :  { %3142 = vmatpush3.bf16.msra.mxu0 %v3752_v47  ;;  %2900 = vmatprep.mubr.msk.f32.mxu0 %vm3506_vm5, %v3505_v30 }
 0x29b   :  { %3143 = vmatprep.subr.bf16.mxu0 %v3504_v20  ;;  %3148 = vmatpush3.bf16.msra.mxu1 %v3692_v19 }
 0x29c   :  { %3149 = vmatprep.subr.bf16.mxu1 %v3504_v20  ;;  %2911 = vmatprep.mubr.msk.f32.mxu1 %vm3506_vm5, %v3505_v30 }
 0x29e   :  { %3145 = vmatpush3.bf16.msra.mxu0 %v3773_v51 }
 0x29f   :  { %3152 = vmatprep.subr.bf16.mxu0 %v3504_v20  ;;  %3151 = vmatpush3.bf16.msra.mxu1 %v3710_v29 }
 0x2a0   :  { %3158 = vmatprep.subr.bf16.mxu1 %v3504_v20 }
 0x2a1   :  { %2901 = vmatmul.mubr.msk.f32.vlgmr.msra.gmra.mrb[22].mxu0 %vm181_vm0, %v1030_v17 }
 0x2a2   :  { %3154 = vmatpush3.bf16.msra.mxu0 %v3739_v41  ;;  %2922 = vmatprep.mubr.msk.f32.mxu0 %vm3506_vm5, %v3505_v30 }
 0x2a3   :  { %3155 = vmatprep.subr.bf16.mxu0 %v3504_v20 }
 0x2a6   :  { %3157 = vmatpush3.bf16.msra.mxu0 %v3755_v48 }
 0x2a7   :  { %3164 = vmatprep.subr.bf16.mxu0 %v3504_v20 }
 0x36c   :  { %v1103_v32 = vpop.f32.mrb[20].mxu0  ;;  %v1173_v18 = vpop.f32.mrb[16].mxu1 }
 0x36d   :  { %v1247_v22 = vadd.f32 %v1103_v32, %v3818_v6  ;;  %v1254_v23 = vadd.f32 %v1173_v18, %v3812_v63  ;;  %v2880_v24 = vpop.f32.mrb[21].mxu0  ;;  %v2891_v27 = vpop.f32.mrb[17].mxu1 }
 0x36f   :  { %v2561_v28 = vmul.f32 -1.442695, %v1247_v22  ;;  %v2562_v34 = vmul.f32 -1.442695, %v1254_v23 }
 0x371   :  { %3271 = vpow2.f32 %v2561_v28 }
 0x372   :  { %3273 = vpow2.f32 %v2562_v34  ;;  %v1515_v34 = vpop.permute.xlu1 %1514 }
 0x374   :  { %v1243_v31 = vpop.f32.mrb[22].mxu0 }
 0x375   :  { %v2902_v33 = vpop.f32.mrb[23].mxu0  ;;  %v1244_v39 = vadd.f32 %v3854_v62, %v1243_v31 }
 0x37b   :  { %v3272_v35 = vpop.eup %3271 }
 0x37c   :  { %v1251_v36 = vadd.f32 1.0, %v3272_v35  ;;  %v3274_v38 = vpop.eup %3273 }
 0x37d   :  { %v1258_v45 = vadd.f32 1.0, %v3274_v38 }
 0x37e   :  { %3275 = vrcp.f32 %v1251_v36 }
 0x388   :  { %v3276_v42 = vpop.eup %3275 }
 0x389   :  { %v1261_v43 = vmul.f32 %v3276_v42, %v1244_v39 }
 0x38b   :  { %v1262_v6 = vadd.f32 %v1261_v43, %v3841_v40 }
 0x38d   :  { %3277 = vtanh.f32 %v1262_v6 }
 0x38e   :  { %3279 = vrcp.f32 %v1258_v45 }
 0x397   :  { %v3278_v63 = vpop.eup %3277 }
 0x398   :  { %v1264_v46 = vsub.f32 %v1030_v17, %v3278_v63  ;;  %v3280_v50 = vpop.eup %3279 }
 0x39a   :  { %v1265_v53 = vmul.f32 %v3280_v50, %v1264_v46 }
 0x39c   :  { %v1266_v56 = vadd.f32 %v3278_v63, %v1265_v53 }
 0x39e   :  { %v1267_v55 = vsub.f32 %v1266_v56, %v1030_v17  ;;  %v1275_v58 = vmul.f32 %v1271_v25, %v1266_v56 }
 0x3a0   :  { %v1273_v60 = vmul.f32 %v1271_v25, %v1267_v55  ;;  %1277 = vst.msk [vmem:[#allocation13 + $0x10] sm:$0xff] %vm181_vm0, %v1275_v58 }
 0x3a2   :  { %v1274_v0 = vadd.f32 %v1273_v60, %v1030_v17 }
 0x3a4   :  { %2912 = vmatmul.mubr.msk.f32.vlgmr.msra.gmra.mrb[18].mxu1 %vm181_vm0, %v1274_v0  ;;  %2923 = vmatmul.mubr.msk.f32.vlgmr.msra.gmra.mrb[24].mxu0 %vm181_vm0, %v1274_v0 }
 0x3a5   :  { %3160 = vmatpush3.bf16.msra.mxu1 %v3752_v47  ;;  %2933 = vmatprep.mubr.msk.f32.mxu1 %vm3506_vm5, %v3505_v30 }
 0x3a6   :  { %3161 = vmatprep.subr.bf16.mxu1 %v3504_v20  ;;  %3166 = vmatpush3.bf16.msra.mxu0 %v3692_v19 }
 0x3a7   :  { %3167 = vmatprep.subr.bf16.mxu0 %v3504_v20  ;;  %2944 = vmatprep.mubr.msk.f32.mxu0 %vm3506_vm5, %v3505_v30 }
 0x3a9   :  { %3163 = vmatpush3.bf16.msra.mxu1 %v3773_v51 }
 0x3aa   :  { %3170 = vmatprep.subr.bf16.mxu1 %v3504_v20  ;;  %3169 = vmatpush3.bf16.msra.mxu0 %v3710_v29 }
 0x3ab   :  { %3176 = vmatprep.subr.bf16.mxu0 %v3504_v20 }
 0x3ac   :  { %2934 = vmatmul.mubr.msk.f32.vlgmr.msra.gmra.mrb[20].mxu1 %vm181_vm0, %v1274_v0 }
 0x3ad   :  { %3172 = vmatpush3.bf16.msra.mxu1 %v3739_v41  ;;  %2955 = vmatprep.mubr.msk.f32.mxu1 %vm3506_vm5, %v3505_v30 }
 0x3ae   :  { %3173 = vmatprep.subr.bf16.mxu1 %v3504_v20 }
 0x3b1   :  { %3175 = vmatpush3.bf16.msra.mxu1 %v3755_v48 }
 0x3b2   :  { %3182 = vmatprep.subr.bf16.mxu1 %v3504_v20 }
 0x477   :  { %v1347_v40 = vpop.f32.mrb[18].mxu1  ;;  %v1417_v59 = vpop.f32.mrb[24].mxu0 }
 0x478   :  { %v1491_v54 = vadd.f32 %v1347_v40, %v3814_v2  ;;  %v1498_v1 = vadd.f32 %v1417_v59, %v3810_v61  ;;  %v2913_v3 = vpop.f32.mrb[19].mxu1  ;;  %v2924_v5 = vpop.f32.mrb[25].mxu0 }
 0x47a   :  { %v2566_v8 = vmul.f32 -1.442695, %v1491_v54  ;;  %v2567_v13 = vmul.f32 -1.442695, %v1498_v1 }
 0x47c   :  { %3281 = vpow2.f32 %v2566_v8  ;;  %v1759_v8 = vpop.permute.xlu0 %1758 }
 0x47d   :  { %3283 = vpow2.f32 %v2567_v13 }
 0x47f   :  { %v1487_v9 = vpop.f32.mrb[20].mxu1 }
 0x480   :  { %v2935_v11 = vpop.f32.mrb[21].mxu1  ;;  %v1488_v18 = vadd.f32 %v3854_v62, %v1487_v9 }
 0x486   :  { %v3282_v16 = vpop.eup %3281 }
 0x487   :  { %v1495_v17 = vadd.f32 1.0, %v3282_v16  ;;  %v3284_v32 = vpop.eup %3283 }
 0x488   :  { %v1502_v24 = vadd.f32 1.0, %v3284_v32 }
 0x489   :  { %3285 = vrcp.f32 %v1495_v17 }
 0x493   :  { %v3286_v22 = vpop.eup %3285 }
 0x494   :  { %v1505_v23 = vmul.f32 %v3286_v22, %v1488_v18 }
 0x496   :  { %v1506_v2 = vadd.f32 %v1505_v23, %v3839_v37 }
 0x498   :  { %3287 = vtanh.f32 %v1506_v2 }
 0x499   :  { %3289 = vrcp.f32 %v1502_v24 }
 0x4a2   :  { %v3288_v61 = vpop.eup %3287 }
 0x4a3   :  { %v1508_v27 = vsub.f32 %v1274_v0, %v3288_v61  ;;  %v3290_v28 = vpop.eup %3289 }
 0x4a5   :  { %v1509_v31 = vmul.f32 %v3290_v28, %v1508_v27 }
 0x4a7   :  { %v1510_v33 = vadd.f32 %v3288_v61, %v1509_v31 }
 0x4a9   :  { %v1511_v35 = vsub.f32 %v1510_v33, %v1274_v0  ;;  %v1519_v36 = vmul.f32 %v1515_v34, %v1510_v33 }
 0x4ab   :  { %1521 = vst.msk [vmem:[#allocation13 + $0x18] sm:$0xff] %vm181_vm0, %v1519_v36  ;;  %v1517_v38 = vmul.f32 %v1515_v34, %v1511_v35 }
 0x4ad   :  { %v1518_v39 = vadd.f32 %v1517_v38, %v1274_v0 }
 0x4af   :  { %2945 = vmatmul.mubr.msk.f32.vlgmr.msra.gmra.mrb[26].mxu0 %vm181_vm0, %v1518_v39  ;;  %2956 = vmatmul.mubr.msk.f32.vlgmr.msra.gmra.mrb[22].mxu1 %vm181_vm0, %v1518_v39 }
 0x4b0   :  { %3178 = vmatpush3.bf16.msra.mxu0 %v3752_v47  ;;  %2966 = vmatprep.mubr.msk.f32.mxu0 %vm3506_vm5, %v3505_v30 }
 0x4b1   :  { %3179 = vmatprep.subr.bf16.mxu0 %v3504_v20  ;;  %3184 = vmatpush3.bf16.msra.mxu1 %v3692_v19 }
 0x4b2   :  { %3185 = vmatprep.subr.bf16.mxu1 %v3504_v20  ;;  %2977 = vmatprep.mubr.msk.f32.mxu1 %vm3506_vm5, %v3505_v30 }
 0x4b4   :  { %3181 = vmatpush3.bf16.msra.mxu0 %v3773_v51 }
 0x4b5   :  { %3188 = vmatprep.subr.bf16.mxu0 %v3504_v20  ;;  %3187 = vmatpush3.bf16.msra.mxu1 %v3710_v29 }
 0x4b6   :  { %3194 = vmatprep.subr.bf16.mxu1 %v3504_v20 }
 0x4b7   :  { %2967 = vmatmul.mubr.msk.f32.vlgmr.msra.gmra.mrb[28].mxu0 %vm181_vm0, %v1518_v39 }
 0x4b8   :  { %3190 = vmatpush3.bf16.msra.mxu0 %v3739_v41  ;;  %2988 = vmatprep.mubr.msk.f32.mxu0 %vm3506_vm5, %v3505_v30 }
 0x4b9   :  { %3191 = vmatprep.subr.bf16.mxu0 %v3504_v20 }
 0x4bc   :  { %3193 = vmatpush3.bf16.msra.mxu0 %v3755_v48 }
 0x4bd   :  { %3200 = vmatprep.subr.bf16.mxu0 %v3504_v20 }
 0x582   :  { %v1591_v37 = vpop.f32.mrb[26].mxu0  ;;  %v1661_v42 = vpop.f32.mrb[22].mxu1 }
 0x583   :  { %v1735_v43 = vadd.f32 %v1591_v37, %v3826_v14  ;;  %v1742_v45 = vadd.f32 %v1661_v42, %v3820_v7  ;;  %v2946_v6 = vpop.f32.mrb[27].mxu0  ;;  %v2957_v63 = vpop.f32.mrb[23].mxu1 }
 0x585   :  { %v2571_v46 = vmul.f32 -1.442695, %v1735_v43  ;;  %v2572_v56 = vmul.f32 -1.442695, %v1742_v45  ;;  %v2003_v45 = vpop.permute.xlu1 %2002 }
 0x587   :  { %3291 = vpow2.f32 %v2571_v46 }
 0x588   :  { %3293 = vpow2.f32 %v2572_v56 }
 0x58a   :  { %v1731_v50 = vpop.f32.mrb[28].mxu0 }
 0x58b   :  { %v2968_v53 = vpop.f32.mrb[29].mxu0  ;;  %v1732_v60 = vadd.f32 %v3854_v62, %v1731_v50 }
 0x591   :  { %v3292_v25 = vpop.eup %3291 }
 0x592   :  { %v1739_v55 = vadd.f32 1.0, %v3292_v25  ;;  %v3294_v58 = vpop.eup %3293 }
 0x593   :  { %v1746_v59 = vadd.f32 1.0, %v3294_v58 }
 0x594   :  { %3295 = vrcp.f32 %v1739_v55 }
 0x59e   :  { %v3296_v0 = vpop.eup %3295 }
 0x59f   :  { %v1749_v40 = vmul.f32 %v3296_v0, %v1732_v60 }
 0x5a1   :  { %v1750_v14 = vadd.f32 %v1749_v40, %v3845_v49 }
 0x5a3   :  { %3297 = vtanh.f32 %v1750_v14 }
 0x5a4   :  { %3299 = vrcp.f32 %v1746_v59 }
 0x5ad   :  { %v3298_v7 = vpop.eup %3297 }
 0x5ae   :  { %v1752_v54 = vsub.f32 %v1518_v39, %v3298_v7  ;;  %v3300_v1 = vpop.eup %3299 }
 0x5b0   :  { %v1753_v3 = vmul.f32 %v3300_v1, %v1752_v54 }
 0x5b2   :  { %v1754_v5 = vadd.f32 %v3298_v7, %v1753_v3 }
 0x5b4   :  { %v1755_v9 = vsub.f32 %v1754_v5, %v1518_v39  ;;  %v1763_v11 = vmul.f32 %v1759_v8, %v1754_v5 }
 0x5b6   :  { %1765 = vst.msk [vmem:[#allocation13 + $0x20] sm:$0xff] %vm181_vm0, %v1763_v11  ;;  %v1761_v13 = vmul.f32 %v1759_v8, %v1755_v9  ;;  %v2247_v9 = vpop.permute.xlu0 %2246 }
 0x5b8   :  { %v1762_v16 = vadd.f32 %v1761_v13, %v1518_v39 }
 0x5ba   :  { %2978 = vmatmul.mubr.msk.f32.vlgmr.msra.gmra.mrb[24].mxu1 %vm181_vm0, %v1762_v16  ;;  %2989 = vmatmul.mubr.msk.f32.vlgmr.msra.gmra.mrb[30].mxu0 %vm181_vm0, %v1762_v16 }
 0x5bb   :  { %3196 = vmatpush3.bf16.msra.mxu1 %v3752_v47  ;;  %2999 = vmatprep.mubr.msk.f32.mxu1 %vm3506_vm5, %v3505_v30 }
 0x5bc   :  { %3197 = vmatprep.subr.bf16.mxu1 %v3504_v20  ;;  %3202 = vmatpush3.bf16.msra.mxu0 %v3692_v19 }
 0x5bd   :  { %3203 = vmatprep.subr.bf16.mxu0 %v3504_v20  ;;  %3010 = vmatprep.mubr.msk.f32.mxu0 %vm3506_vm5, %v3505_v30 }
 0x5bf   :  { %3199 = vmatpush3.bf16.msra.mxu1 %v3773_v51 }
 0x5c0   :  { %3206 = vmatprep.subr.bf16.mxu1 %v3504_v20  ;;  %3205 = vmatpush3.bf16.msra.mxu0 %v3710_v29 }
 0x5c1   :  { %3212 = vmatprep.subr.bf16.mxu0 %v3504_v20 }
 0x5c2   :  { %3000 = vmatmul.mubr.msk.f32.vlgmr.msra.gmra.mrb[26].mxu1 %vm181_vm0, %v1762_v16 }
 0x5c3   :  { %3208 = vmatpush3.bf16.msra.mxu1 %v3739_v41  ;;  %3021 = vmatprep.mubr.msk.f32.mxu1 %vm3506_vm5, %v3505_v30 }
 0x5c4   :  { %3209 = vmatprep.subr.bf16.mxu1 %v3504_v20 }
 0x5c7   :  { %3211 = vmatpush3.bf16.msra.mxu1 %v3755_v48 }
 0x5c8   :  { %3218 = vmatprep.subr.bf16.mxu1 %v3504_v20 }
 0x68d   :  { %v1835_v49 = vpop.f32.mrb[24].mxu1  ;;  %v1905_v17 = vpop.f32.mrb[30].mxu0 }
 0x68e   :  { %v1979_v32 = vadd.f32 %v1835_v49, %v3822_v10  ;;  %v1986_v18 = vadd.f32 %v1905_v17, %v3816_v4  ;;  %v2979_v22 = vpop.f32.mrb[25].mxu1  ;;  %v2990_v23 = vpop.f32.mrb[31].mxu0 }
 0x690   :  { %v2576_v24 = vmul.f32 -1.442695, %v1979_v32  ;;  %v2577_v27 = vmul.f32 -1.442695, %v1986_v18 }
 0x692   :  { %3301 = vpow2.f32 %v2576_v24 }
 0x693   :  { %3303 = vpow2.f32 %v2577_v27 }
 0x695   :  { %v1975_v2 = vpop.f32.mrb[26].mxu1 }
 0x696   :  { %v3001_v61 = vpop.f32.mrb[27].mxu1  ;;  %v1976_v34 = vadd.f32 %v3854_v62, %v1975_v2 }
 0x69c   :  { %v3302_v28 = vpop.eup %3301 }
 0x69d   :  { %v1983_v31 = vadd.f32 1.0, %v3302_v28  ;;  %v3304_v33 = vpop.eup %3303 }
 0x69e   :  { %v1990_v38 = vadd.f32 1.0, %v3304_v33 }
 0x69f   :  { %3305 = vrcp.f32 %v1983_v31 }
 0x6a9   :  { %v3306_v35 = vpop.eup %3305 }
 0x6aa   :  { %v1993_v36 = vmul.f32 %v3306_v35, %v1976_v34 }
 0x6ac   :  { %v1994_v10 = vadd.f32 %v1993_v36, %v3843_v44 }
 0x6ae   :  { %3307 = vtanh.f32 %v1994_v10  ;;  %v2490_v10 = vpop.permute.xlu1 %2489 }
 0x6af   :  { %3309 = vrcp.f32 %v1990_v38 }
 0x6b8   :  { %v3308_v4 = vpop.eup %3307 }
 0x6b9   :  { %v1996_v39 = vsub.f32 %v1762_v16, %v3308_v4  ;;  %v3310_v37 = vpop.eup %3309 }
 0x6bb   :  { %v1997_v42 = vmul.f32 %v3310_v37, %v1996_v39 }
 0x6bd   :  { %v1998_v43 = vadd.f32 %v3308_v4, %v1997_v42 }
 0x6bf   :  { %v1999_v6 = vsub.f32 %v1998_v43, %v1762_v16  ;;  %v2007_v63 = vmul.f32 %v2003_v45, %v1998_v43 }
 0x6c1   :  { %2009 = vst.msk [vmem:[#allocation13 + $0x28] sm:$0xff] %vm181_vm0, %v2007_v63  ;;  %v2005_v46 = vmul.f32 %v2003_v45, %v1999_v6 }
 0x6c3   :  { %v2006_v50 = vadd.f32 %v2005_v46, %v1762_v16 }
 0x6c5   :  { %3011 = vmatmul.mubr.msk.f32.vlgmr.msra.gmra.mrb[32].mxu0 %vm181_vm0, %v2006_v50  ;;  %3022 = vmatmul.mubr.msk.f32.vlgmr.msra.gmra.mrb[28].mxu1 %vm181_vm0, %v2006_v50 }
 0x6c6   :  { %3214 = vmatpush3.bf16.msra.mxu0 %v3752_v47  ;;  %3032 = vmatprep.mubr.msk.f32.mxu0 %vm3506_vm5, %v3505_v30 }
 0x6c7   :  { %3215 = vmatprep.subr.bf16.mxu0 %v3504_v20  ;;  %3220 = vmatpush3.bf16.msra.mxu1 %v3692_v19 }
 0x6c8   :  { %3221 = vmatprep.subr.bf16.mxu1 %v3504_v20  ;;  %3043 = vmatprep.mubr.msk.f32.mxu1 %vm3506_vm5, %v3505_v30 }
 0x6ca   :  { %3217 = vmatpush3.bf16.msra.mxu0 %v3773_v51 }
 0x6cb   :  { %3224 = vmatprep.subr.bf16.mxu0 %v3504_v20  ;;  %3223 = vmatpush3.bf16.msra.mxu1 %v3710_v29 }
 0x6cc   :  { %3230 = vmatprep.subr.bf16.mxu1 %v3504_v20 }
 0x6cd   :  { %3033 = vmatmul.mubr.msk.f32.vlgmr.msra.gmra.mrb[34].mxu0 %vm181_vm0, %v2006_v50 }
 0x6ce   :  { %3226 = vmatpush3.bf16.msra.mxu0 %v3739_v41  ;;  %3054 = vmatprep.mubr.msk.f32.mxu0 %vm3506_vm5, %v3505_v30 }
 0x6cf   :  { %3227 = vmatprep.subr.bf16.mxu0 %v3504_v20 }
 0x6d2   :  { %3229 = vmatpush3.bf16.msra.mxu0 %v3755_v48 }
 0x798   :  { %v2079_v19 = vpop.f32.mrb[32].mxu0  ;;  %v2149_v44 = vpop.f32.mrb[28].mxu1 }
 0x799   :  { %v2223_v53 = vadd.f32 %v2079_v19, %v3832_v26  ;;  %v2230_v56 = vadd.f32 %v2149_v44, %v3828_v15  ;;  %v3012_v29 = vpop.f32.mrb[33].mxu0  ;;  %v3023_v25 = vpop.f32.mrb[29].mxu1 }
 0x79b   :  { %v2581_v55 = vmul.f32 -1.442695, %v2223_v53  ;;  %v2582_v41 = vmul.f32 -1.442695, %v2230_v56 }
 0x79d   :  { %3311 = vpow2.f32 %v2581_v55 }
 0x79e   :  { %3313 = vpow2.f32 %v2582_v41 }
 0x7a0   :  { %v2219_v58 = vpop.f32.mrb[34].mxu0 }
 0x7a1   :  { %v3034_v60 = vpop.f32.mrb[35].mxu0  ;;  %v2220_v48 = vadd.f32 %v3854_v62, %v2219_v58 }
 0x7a7   :  { %v3312_v0 = vpop.eup %3311 }
 0x7a8   :  { %v2227_v40 = vadd.f32 1.0, %v3312_v0  ;;  %v3314_v59 = vpop.eup %3313 }
 0x7a9   :  { %v2234_v54 = vadd.f32 1.0, %v3314_v59 }
 0x7aa   :  { %3315 = vrcp.f32 %v2227_v40 }
 0x7b4   :  { %v3316_v14 = vpop.eup %3315 }
 0x7b5   :  { %v2237_v7 = vmul.f32 %v3316_v14, %v2220_v48 }
 0x7b7   :  { %v2238_v26 = vadd.f32 %v2237_v7, %v3849_v57 }
 0x7b9   :  { %3317 = vtanh.f32 %v2238_v26 }
 0x7ba   :  { %3319 = vrcp.f32 %v2234_v54 }
 0x7c3   :  { %v3318_v15 = vpop.eup %3317 }
 0x7c4   :  { %v2240_v1 = vsub.f32 %v2006_v50, %v3318_v15  ;;  %v3320_v3 = vpop.eup %3319 }
 0x7c6   :  { %v2241_v5 = vmul.f32 %v3320_v3, %v2240_v1 }
 0x7c8   :  { %v2242_v8 = vadd.f32 %v3318_v15, %v2241_v5 }
 0x7ca   :  { %v2251_v11 = vmul.f32 %v2247_v9, %v2242_v8  ;;  %v2243_v13 = vsub.f32 %v2242_v8, %v2006_v50 }
 0x7cc   :  { %2253 = vst.msk [vmem:[#allocation13 + $0x30] sm:$0xff] %vm181_vm0, %v2251_v11  ;;  %v2249_v16 = vmul.f32 %v2247_v9, %v2243_v13 }
 0x7ce   :  { %v2250_v49 = vadd.f32 %v2249_v16, %v2006_v50 }
 0x7d0   :  { %3044 = vmatmul.mubr.msk.f32.vlgmr.msra.gmra.mrb[30].mxu1 %vm181_vm0, %v2250_v49  ;;  %3055 = vmatmul.mubr.msk.f32.vlgmr.msra.gmra.mrb[36].mxu0 %vm181_vm0, %v2250_v49 }
 0x7d1   :  { %3232 = vmatpush3.bf16.msra.mxu1 %v3752_v47  ;;  %3065 = vmatprep.mubr.msk.f32.mxu1 %vm3506_vm5, %v3505_v30 }
 0x7d2   :  { %3233 = vmatprep.subr.bf16.mxu1 %v3504_v20 }
 0x7d5   :  { %3235 = vmatpush3.bf16.msra.mxu1 %v3773_v51 }
 0x7d8   :  { %3066 = vmatmul.mubr.msk.f32.vlgmr.msra.gmra.mrb[32].mxu1 %vm181_vm0, %v2250_v49 }
 0x8a3   :  { %v2323_v57 = vpop.f32.mrb[30].mxu1  ;;  %v2393_v17 = vpop.f32.mrb[36].mxu0 }
 0x8a4   :  { %v2467_v32 = vadd.f32 %v2323_v57, %v3830_v21  ;;  %v2474_v18 = vadd.f32 %v2393_v17, %v3824_v12  ;;  %v3045_v22 = vpop.f32.mrb[31].mxu1  ;;  %v3056_v23 = vpop.f32.mrb[37].mxu0 }
 0x8a6   :  { %v2586_v24 = vmul.f32 -1.442695, %v2467_v32  ;;  %v2587_v61 = vmul.f32 -1.442695, %v2474_v18 }
 0x8a8   :  { %3321 = vpow2.f32 %v2586_v24 }
 0x8a9   :  { %3323 = vpow2.f32 %v2587_v61 }
 0x8ab   :  { %v2463_v47 = vpop.f32.mrb[32].mxu1 }
 0x8ac   :  { %v3067_v2 = vpop.f32.mrb[33].mxu1  ;;  %v2464_v51 = vadd.f32 %v3854_v62, %v2463_v47 }
 0x8b2   :  { %v3322_v30 = vpop.eup %3321 }
 0x8b3   :  { %v2471_v27 = vadd.f32 1.0, %v3322_v30  ;;  %v3324_v20 = vpop.eup %3323 }
 0x8b4   :  { %v2478_v33 = vadd.f32 1.0, %v3324_v20 }
 0x8b5   :  { %3325 = vrcp.f32 %v2471_v27 }
 0x8bf   :  { %v3326_v28 = vpop.eup %3325 }
 0x8c0   :  { %v2481_v31 = vmul.f32 %v3326_v28, %v2464_v51 }
 0x8c2   :  { %v2482_v21 = vadd.f32 %v2481_v31, %v3847_v52 }
 0x8c4   :  { %3327 = vtanh.f32 %v2482_v21 }
 0x8c5   :  { %3329 = vrcp.f32 %v2478_v33 }
 0x8ce   :  { %v3328_v12 = vpop.eup %3327 }
 0x8cf   :  { %v2484_v34 = vsub.f32 %v2250_v49, %v3328_v12  ;;  %v3330_v35 = vpop.eup %3329 }
 0x8d1   :  { %v2485_v36 = vmul.f32 %v3330_v35, %v2484_v34 }
 0x8d3   :  { %v2486_v38 = vadd.f32 %v3328_v12, %v2485_v36 }
 0x8d5   :  { %v2492_v4 = vmul.f32 %v2490_v10, %v2486_v38 }
 0x8d7   :  { %2494 = vst.msk [vmem:[#allocation13 + $0x38] sm:$0xff] %vm181_vm0, %v2492_v4 }
 0x8d8   :  { %3474 = shalt.err (!%p3471_p10)
}
 0x8d9   :  { %s3475_s30 = scalar_lea.hbm %s4070_s12, 1024 }
 0x8da   :  { %p3476_p11 = scmp.ne.s32.totalorder %s4070_s12, %s3475_s30  ;;  %p3479_p12 = scmp.lt.u32.totalorder %s3475_s30, %s4070_s12 }
 0x8dc   :  { %p3481_p13 = pnand %p3479_p12, %p3476_p11 }
 0x8de   :  { %3484 = shalt.err (!%p3481_p13)
}
 0x8df   :  { %2506 = dma.vmem_to_hbm [thread:$0]  %s2501_s13, 1024, %s4070_s12, [#allocation4], %s3497_s15, %s3497_s15, %s3498_s16  }
 0x8e0   :  { %3493 = dma.done.wait [#allocation4], 1024  }
 0x8e1   :  { %3494 = vsyncadd [#allocation4], 4294966272 }
 0x8e2   :  { %2510 = vsyncpa [#allocation3], 1 }
 0x8e3   :  { %2511 = vsyncpa [#allocation6], 1 }
 0x8e4   :  { %2512 = vsyncpa [#allocation9], 1 }
 0x8e5   :  { %2513 = vsyncpa [#allocation12], 1 }
 0x8e6   :  { %2514 = vsyncpa [#allocation4], 1 }

</bundles_post_ra>
